<compile_context>
chip_gen: v7x
topology: tpu7x:2x2x1
jax: 0.10.0
libtpu: 0.0.40
codegen_flags: <defaults>
</compile_context>

<pallas_src>
import functools

import jax
import jax.numpy as jnp
from jax import lax
from jax.experimental import pallas as pl
from jax.experimental.pallas import tpu as pltpu

_UNROLL_MAX_STEPS = 8


# ----------------------------------------------------------------------------
# Kernel helpers
# ----------------------------------------------------------------------------
def _make_step(xg_ref, whh, bih, bhh, hidden, batch, out_ref):
    """One GRU time step.  xg_ref holds the hoisted input projections."""

    def step(t, h):
        row = t * batch
        gx = xg_ref[pl.ds(row, batch), :] + bih                 # (B, 3H)
        gh = jnp.dot(h.astype(jnp.bfloat16), whh,
                     preferred_element_type=jnp.float32) + bhh  # (B, 3H)
        r = jax.nn.sigmoid(gx[:, :hidden] + gh[:, :hidden])
        z = jax.nn.sigmoid(gx[:, hidden:2 * hidden] + gh[:, hidden:2 * hidden])
        n = jnp.tanh(gx[:, 2 * hidden:] + r * gh[:, 2 * hidden:])
        h_new = (1.0 - z) * n + z * h
        if out_ref is not None:
            out_ref[pl.ds(row, batch), :] = h_new.astype(out_ref.dtype)
        return h_new

    return step


def _run_recurrence(step, chunk, h_ref):
    if chunk <= _UNROLL_MAX_STEPS:
        # Fully unrolled: scheduler can overlap the next step's h@W_hh push
        # with the previous step's sigmoid/tanh EUP latency.
        h = h_ref[...]
        for t in range(chunk):
            h = step(t, h)
        h_ref[...] = h
    else:
        h_ref[...] = lax.fori_loop(0, chunk, step, h_ref[...])


def _project_chunk(x_ref, wih_ref, xg_ref):
    # All three input-gate projections for the whole chunk: one big
    # (chunk*B, F) x (F, 3H) MXU matmul, off the serial critical path.
    xg_ref[...] = jnp.dot(x_ref[...].astype(jnp.bfloat16), wih_ref[...],
                          preferred_element_type=jnp.float32)


# ----------------------------------------------------------------------------
# Pallas kernels
# ----------------------------------------------------------------------------
def _gru_seq_kernel(x_ref, wih_ref, whh_ref, bih_ref, bhh_ref,
                    out_ref, h_ref, xg_ref, *, hidden, batch, chunk):
    @pl.when(pl.program_id(0) == 0)
    def _():
        h_ref[...] = jnp.zeros_like(h_ref)

    _project_chunk(x_ref, wih_ref, xg_ref)

    whh = whh_ref[...]
    bih = jnp.broadcast_to(bih_ref[...], (batch, 3 * hidden))
    bhh = jnp.broadcast_to(bhh_ref[...], (batch, 3 * hidden))
    step = _make_step(xg_ref, whh, bih, bhh, hidden, batch, out_ref)
    _run_recurrence(step, chunk, h_ref)


def _gru_last_fc_kernel(x_ref, wih_ref, whh_ref, bih_ref, bhh_ref,
                        fcw_ref, fcb_ref, out_ref, h_ref, xg_ref,
                        *, hidden, batch, chunk):
    @pl.when(pl.program_id(0) == 0)
    def _():
        h_ref[...] = jnp.zeros_like(h_ref)

    _project_chunk(x_ref, wih_ref, xg_ref)

    whh = whh_ref[...]
    bih = jnp.broadcast_to(bih_ref[...], (batch, 3 * hidden))
    bhh = jnp.broadcast_to(bhh_ref[...], (batch, 3 * hidden))
    step = _make_step(xg_ref, whh, bih, bhh, hidden, batch, None)
    _run_recurrence(step, chunk, h_ref)

    @pl.when(pl.program_id(0) == pl.num_programs(0) - 1)
    def _():
        out_ref[...] = (jnp.dot(h_ref[...].astype(jnp.bfloat16), fcw_ref[...],
                                preferred_element_type=jnp.float32)
                        + fcb_ref[...])


# ----------------------------------------------------------------------------
# Wrappers
# ----------------------------------------------------------------------------
def _round_up(n, m):
    return -(-n // m) * m


def _pick_chunk(t, target):
    c = max(1, min(t, target))
    while t % c:
        c -= 1
    return c


def _vmem_limit(rows, fin, hp, bp, cp=0):
    est = (2 * rows * fin * 2               # x chunk (bf16, double-buffered)
           + 2 * rows * hp * 2              # out chunk (bf16, double-buffered)
           + 2 * (fin + hp) * 3 * hp * 2    # W_ih^T + W_hh^T (bf16)
           + 4 * 3 * hp * 4                 # biases
           + rows * 3 * hp * 4              # hoisted projections scratch (f32)
           + bp * hp * 4                    # h carry
           + 2 * (hp * cp * 2 + bp * cp * 4 + cp * 4))
    return int(min(max(2 * est, 32 * 2 ** 20), 48 * 2 ** 20))


def _prep_gru_weights(w_ih, w_hh, b_ih, b_hh, h, hp, fin_p):
    """Split torch's fused (3H, .) r/z/n tensors, zero-pad each gate block to
    the padded hidden width, re-fuse and pre-transpose so the kernel does one
    (., 3*Hp) matmul per projection.  Weights -> bf16 (MXU), biases stay f32."""

    def pad2(a, r, c):
        return jnp.pad(a, ((0, r - a.shape[0]), (0, c - a.shape[1])))

    wih_g = [pad2(w_ih[g * h:(g + 1) * h, :], hp, fin_p) for g in range(3)]
    whh_g = [pad2(w_hh[g * h:(g + 1) * h, :], hp, hp) for g in range(3)]
    bih_g = [jnp.pad(b_ih[g * h:(g + 1) * h], (0, hp - h)) for g in range(3)]
    bhh_g = [jnp.pad(b_hh[g * h:(g + 1) * h], (0, hp - h)) for g in range(3)]

    wih_t = jnp.concatenate(wih_g, axis=0).T.astype(jnp.bfloat16)   # (fin_p,3Hp)
    whh_t = jnp.concatenate(whh_g, axis=0).T.astype(jnp.bfloat16)   # (Hp, 3Hp)
    bih_f = jnp.concatenate(bih_g).reshape(1, 3 * hp).astype(jnp.float32)
    bhh_f = jnp.concatenate(bhh_g).reshape(1, 3 * hp).astype(jnp.float32)
    return wih_t, whh_t, bih_f, bhh_f


def _gru_layer_seq(seq2d, wih_t, whh_t, bih, bhh, *, T, Bp, Hp, chunk):
    fin = seq2d.shape[1]
    rows = chunk * Bp
    kernel = functools.partial(_gru_seq_kernel, hidden=Hp, batch=Bp, chunk=chunk)
    return pl.pallas_call(
        kernel,
        out_shape=jax.ShapeDtypeStruct((T * Bp, Hp), jnp.bfloat16),
        grid_spec=pltpu.PrefetchScalarGridSpec(
            num_scalar_prefetch=0,
            grid=(T // chunk,),
            in_specs=[
                pl.BlockSpec((rows, fin), lambda t: (t, 0)),      # x chunk
                pl.BlockSpec((fin, 3 * Hp), lambda t: (0, 0)),    # W_ih^T fused
                pl.BlockSpec((Hp, 3 * Hp), lambda t: (0, 0)),     # W_hh^T fused
                pl.BlockSpec((1, 3 * Hp), lambda t: (0, 0)),      # b_ih
                pl.BlockSpec((1, 3 * Hp), lambda t: (0, 0)),      # b_hh
            ],
            out_specs=pl.BlockSpec((rows, Hp), lambda t: (t, 0)),
            scratch_shapes=[pltpu.VMEM((Bp, Hp), jnp.float32),        # h carry
                            pltpu.VMEM((rows, 3 * Hp), jnp.float32)], # x-proj
        ),
        compiler_params=pltpu.CompilerParams(
            dimension_semantics=("arbitrary",),
            vmem_limit_bytes=_vmem_limit(rows, fin, Hp, Bp)),
    )(seq2d, wih_t, whh_t, bih, bhh)


def _gru_layer_last_fc(seq2d, wih_t, whh_t, bih, bhh, fcw_t, fcb, *,
                       T, Bp, Hp, Cp, chunk):
    fin = seq2d.shape[1]
    rows = chunk * Bp
    kernel = functools.partial(_gru_last_fc_kernel, hidden=Hp, batch=Bp,
                               chunk=chunk)
    return pl.pallas_call(
        kernel,
        out_shape=jax.ShapeDtypeStruct((Bp, Cp), jnp.float32),
        grid_spec=pltpu.PrefetchScalarGridSpec(
            num_scalar_prefetch=0,
            grid=(T // chunk,),
            in_specs=[
                pl.BlockSpec((rows, fin), lambda t: (t, 0)),
                pl.BlockSpec((fin, 3 * Hp), lambda t: (0, 0)),
                pl.BlockSpec((Hp, 3 * Hp), lambda t: (0, 0)),
                pl.BlockSpec((1, 3 * Hp), lambda t: (0, 0)),
                pl.BlockSpec((1, 3 * Hp), lambda t: (0, 0)),
                pl.BlockSpec((Hp, Cp), lambda t: (0, 0)),         # fc weight
                pl.BlockSpec((1, Cp), lambda t: (0, 0)),          # fc bias
            ],
            out_specs=pl.BlockSpec((Bp, Cp), lambda t: (0, 0)),
            scratch_shapes=[pltpu.VMEM((Bp, Hp), jnp.float32),
                            pltpu.VMEM((rows, 3 * Hp), jnp.float32)],
        ),
        compiler_params=pltpu.CompilerParams(
            dimension_semantics=("arbitrary",),
            vmem_limit_bytes=_vmem_limit(rows, fin, Hp, Bp, Cp)),
    )(seq2d, wih_t, whh_t, bih, bhh, fcw_t, fcb)


@functools.partial(jax.jit, static_argnames=("num_layers", "time_chunk"))
def gru_forward(x, params, num_layers, time_chunk=32):
    """Full GRU module forward (eval mode).  x: (batch, seq, input_size)."""
    B, T, F = x.shape
    H = params["w_hh_l0"].shape[1]
    C = params["fc_w"].shape[0]
    Bp = _round_up(B, 8)      # sublane multiple
    Hp = _round_up(H, 128)    # lane-dense matmul N dim
    Cp = _round_up(C, 128)
    chunk = _pick_chunk(T, time_chunk)

    # GaussianNoise is identity in eval mode.
    # Time-major, batch padded to sublanes, flattened to a 2-D (T*Bp, F) slab.
    xt = jnp.transpose(x, (1, 0, 2))
    xt = jnp.pad(xt, ((0, 0), (0, Bp - B), (0, 0)))
    seq2d = xt.reshape(T * Bp, F).astype(jnp.bfloat16)

    out = None
    for l in range(num_layers):
        fin_p = F if l == 0 else Hp
        wih_t, whh_t, bih, bhh = _prep_gru_weights(
            params[f"w_ih_l{l}"], params[f"w_hh_l{l}"],
            params[f"b_ih_l{l}"], params[f"b_hh_l{l}"], H, Hp, fin_p)
        if l < num_layers - 1:
            seq2d = _gru_layer_seq(seq2d, wih_t, whh_t, bih, bhh,
                                   T=T, Bp=Bp, Hp=Hp, chunk=chunk)
        else:
            fcw_t = jnp.pad(params["fc_w"],
                            ((0, Cp - C), (0, Hp - H))).T.astype(jnp.bfloat16)
            fcb = jnp.pad(params["fc_b"],
                          (0, Cp - C)).reshape(1, Cp).astype(jnp.float32)
            out = _gru_layer_last_fc(seq2d, wih_t, whh_t, bih, bhh, fcw_t, fcb,
                                     T=T, Bp=Bp, Hp=Hp, Cp=Cp, chunk=chunk)
    return out[:B, :C]


# ----------------------------------------------------------------------------
# Pure-JAX reference (torch.nn.GRU math, same matmul precision policy)
# ----------------------------------------------------------------------------
def gru_forward_ref(x, params, num_layers, matmul_dtype=jnp.bfloat16):
    B = x.shape[0]

    def mm(a, b):
        return jax.lax.dot(a.astype(matmul_dtype), b.astype(matmul_dtype),
                           preferred_element_type=jnp.float32)

    seq = jnp.transpose(x, (1, 0, 2)).astype(jnp.float32)   # (T, B, F)
    for l in range(num_layers):
        w_ih = params[f"w_ih_l{l}"]; w_hh = params[f"w_hh_l{l}"]
        b_ih = params[f"b_ih_l{l}"]; b_hh = params[f"b_hh_l{l}"]
        H = w_hh.shape[1]
        h0 = jnp.zeros((B, H), jnp.float32)

        def step(h, x_t):
            gi = mm(x_t, w_ih.T) + b_ih
            gh = mm(h, w_hh.T) + b_hh
            r = jax.nn.sigmoid(gi[:, :H] + gh[:, :H])
            z = jax.nn.sigmoid(gi[:, H:2 * H] + gh[:, H:2 * H])
            n = jnp.tanh(gi[:, 2 * H:] + r * gh[:, 2 * H:])
            h_new = (1.0 - z) * n + z * h
            return h_new, h_new

        _, seq = lax.scan(step, h0, seq)
    return mm(seq[-1], params["fc_w"].T) + params["fc_b"]


# ----------------------------------------------------------------------------
# Deterministic parameter init (torch-style uniform(-1/sqrt(H), 1/sqrt(H)))
# ----------------------------------------------------------------------------
def init_params(key, input_size, hidden_size, num_layers, num_classes):
    k = 1.0 / jnp.sqrt(jnp.float32(hidden_size))
    params = {}
    for l in range(num_layers):
        f_in = input_size if l == 0 else hidden_size
        key, *ks = jax.random.split(key, 5)
        params[f"w_ih_l{l}"] = jax.random.uniform(
            ks[0], (3 * hidden_size, f_in), jnp.float32, -k, k)
        params[f"w_hh_l{l}"] = jax.random.uniform(
            ks[1], (3 * hidden_size, hidden_size), jnp.float32, -k, k)
        params[f"b_ih_l{l}"] = jax.random.uniform(
            ks[2], (3 * hidden_size,), jnp.float32, -k, k)
        params[f"b_hh_l{l}"] = jax.random.uniform(
            ks[3], (3 * hidden_size,), jnp.float32, -k, k)
    key, k1, k2 = jax.random.split(key, 3)
    params["fc_w"] = jax.random.uniform(
        k1, (num_classes, hidden_size), jnp.float32, -k, k)
    params["fc_b"] = jax.random.uniform(
        k2, (num_classes,), jnp.float32, -k, k)
    return params


if __name__ == "__main__":
    batch, seq_len, input_size = 2, 8, 16
    hidden_size, num_layers, num_classes = 32, 2, 4

    key = jax.random.PRNGKey(0)
    key, kx = jax.random.split(key)
    x = jax.random.normal(kx, (batch, seq_len, input_size), jnp.float32)
    params = init_params(key, input_size, hidden_size, num_layers, num_classes)

    # time_chunk=4 -> 2 time chunks, exercising the cross-chunk hidden carry.
    out = gru_forward(x, params, num_layers=num_layers, time_chunk=4)
    out = jax.block_until_ready(out)
    assert out.shape == (batch, num_classes)

    ref_matched = gru_forward_ref(x, params, num_layers,
                                  matmul_dtype=jnp.bfloat16)
    ref_f32 = gru_forward_ref(x, params, num_layers, matmul_dtype=jnp.float32)
    assert jnp.allclose(out, ref_matched, rtol=5e-3, atol=5e-3), (out, ref_matched)
    assert jnp.allclose(out, ref_f32, rtol=5e-2, atol=5e-2), (out, ref_f32)

    print("KERNEL_OK")
</pallas_src>

<mosaic_0001>
module attributes {stable_mosaic.version = 11 : i64} {
  func.func @_gru_seq_kernel(%arg0: i32, %arg1: memref<32x16xbf16, #tpu.memory_space<vmem>>, %arg2: memref<16x384xbf16, #tpu.memory_space<vmem>>, %arg3: memref<128x384xbf16, #tpu.memory_space<vmem>>, %arg4: memref<1x384xf32, #tpu.memory_space<vmem>>, %arg5: memref<1x384xf32, #tpu.memory_space<vmem>>, %arg6: memref<32x128xbf16, #tpu.memory_space<vmem>>, %arg7: memref<8x128xf32, #tpu.memory_space<vmem>>, %arg8: memref<32x384xf32, #tpu.memory_space<vmem>>) attributes {dimension_semantics = [#tpu.dimension_semantics<arbitrary>], iteration_bounds = array<i64: 2>, scalar_prefetch = 0 : i64, scratch_operands = 2 : i64, tpu.core_type = #tpu.core_type<tc>, window_params = [{transform_indices = @transform_0, window_bounds = array<i64: 32, 16>}, {pipeline_mode = #tpu.pipeline_mode<synchronous>, transform_indices = @transform_1, window_bounds = array<i64: 16, 384>}, {pipeline_mode = #tpu.pipeline_mode<synchronous>, transform_indices = @transform_2, window_bounds = array<i64: 128, 384>}, {pipeline_mode = #tpu.pipeline_mode<synchronous>, transform_indices = @transform_3, window_bounds = array<i64: 1, 384>}, {pipeline_mode = #tpu.pipeline_mode<synchronous>, transform_indices = @transform_4, window_bounds = array<i64: 1, 384>}, {transform_indices = @transform_5, window_bounds = array<i64: 32, 128>}]} {
    %c0_i32 = arith.constant 0 : i32
    %0 = arith.cmpi eq, %arg0, %c0_i32 : i32
    %1 = arith.extui %0 : i1 to i32
    %c0_i32_0 = arith.constant 0 : i32
    %2 = arith.cmpi ne, %1, %c0_i32_0 : i32
    scf.if %2 {
      %cst_45 = arith.constant 0.000000e+00 : f32
      %148 = vector.broadcast %cst_45 : f32 to vector<8x128xf32>
      %c0_46 = arith.constant 0 : index
      %c0_47 = arith.constant 0 : index
      %149 = vector.load %arg7[%c0_46, %c0_47] : memref<8x128xf32, #tpu.memory_space<vmem>>, vector<8x128xf32>
      tpu.vector_store %arg7[%c0_46, %c0_47], %148 {strides = array<i32>} : memref<8x128xf32, #tpu.memory_space<vmem>>, vector<8x128xf32>,
    } else {
    }
    %c0 = arith.constant 0 : index
    %c0_1 = arith.constant 0 : index
    %3 = vector.load %arg1[%c0, %c0_1] : memref<32x16xbf16, #tpu.memory_space<vmem>>, vector<32x16xbf16>
    %c0_2 = arith.constant 0 : index
    %c0_3 = arith.constant 0 : index
    %4 = vector.load %arg2[%c0_2, %c0_3] : memref<16x384xbf16, #tpu.memory_space<vmem>>, vector<16x384xbf16>
    %cst = arith.constant dense<0.000000e+00> : vector<32x384xf32>
    %5 = tpu.matmul %3, %4, %cst {dimension_numbers = #tpu.dot_dimension_numbers<[1], [0], [0], [1], [0, 0, 1, 1], [], []>} : vector<32x16xbf16>, vector<16x384xbf16>, vector<32x384xf32> -> vector<32x384xf32>
    %c0_4 = arith.constant 0 : index
    %c0_5 = arith.constant 0 : index
    %6 = vector.load %arg8[%c0_4, %c0_5] : memref<32x384xf32, #tpu.memory_space<vmem>>, vector<32x384xf32>
    tpu.vector_store %arg8[%c0_4, %c0_5], %5 {strides = array<i32>} : memref<32x384xf32, #tpu.memory_space<vmem>>, vector<32x384xf32>,
    %c0_6 = arith.constant 0 : index
    %c0_7 = arith.constant 0 : index
    %7 = vector.load %arg3[%c0_6, %c0_7] : memref<128x384xbf16, #tpu.memory_space<vmem>>, vector<128x384xbf16>
    %c0_8 = arith.constant 0 : index
    %c0_9 = arith.constant 0 : index
    %8 = vector.load %arg4[%c0_8, %c0_9] : memref<1x384xf32, #tpu.memory_space<vmem>>, vector<1x384xf32>
    %9 = vector.shape_cast %8 : vector<1x384xf32> to vector<1x384xf32>
    %10 = vector.broadcast %9 : vector<1x384xf32> to vector<8x384xf32>
    %c0_10 = arith.constant 0 : index
    %c0_11 = arith.constant 0 : index
    %11 = vector.load %arg5[%c0_10, %c0_11] : memref<1x384xf32, #tpu.memory_space<vmem>>, vector<1x384xf32>
    %12 = vector.shape_cast %11 : vector<1x384xf32> to vector<1x384xf32>
    %13 = vector.broadcast %12 : vector<1x384xf32> to vector<8x384xf32>
    %c0_12 = arith.constant 0 : index
    %c0_13 = arith.constant 0 : index
    %14 = vector.load %arg7[%c0_12, %c0_13] : memref<8x128xf32, #tpu.memory_space<vmem>>, vector<8x128xf32>
    %c0_14 = arith.constant 0 : index
    %c0_15 = arith.constant 0 : index
    %15 = vector.load %arg8[%c0_14, %c0_15] : memref<32x384xf32, #tpu.memory_space<vmem>>, vector<8x384xf32>
    %16 = arith.addf %15, %10 : vector<8x384xf32>
    %17 = arith.truncf %14 : vector<8x128xf32> to vector<8x128xbf16>
    %cst_16 = arith.constant dense<0.000000e+00> : vector<8x384xf32>
    %18 = tpu.matmul %17, %7, %cst_16 {dimension_numbers = #tpu.dot_dimension_numbers<[1], [0], [0], [1], [0, 0, 1, 1], [], []>} : vector<8x128xbf16>, vector<128x384xbf16>, vector<8x384xf32> -> vector<8x384xf32>
    %19 = arith.addf %18, %13 : vector<8x384xf32>
    %20 = vector.extract_strided_slice %16 {offsets = [0, 0], sizes = [8, 128], strides = [1, 1]} : vector<8x384xf32> to vector<8x128xf32>
    %21 = vector.extract_strided_slice %19 {offsets = [0, 0], sizes = [8, 128], strides = [1, 1]} : vector<8x384xf32> to vector<8x128xf32>
    %22 = arith.addf %20, %21 : vector<8x128xf32>
    %23 = arith.negf %22 : vector<8x128xf32>
    %24 = math.exp %23 : vector<8x128xf32>
    %cst_17 = arith.constant 1.000000e+00 : f32
    %25 = vector.broadcast %cst_17 : f32 to vector<8x128xf32>
    %26 = arith.addf %25, %24 : vector<8x128xf32>
    %27 = arith.divf %25, %26 : vector<8x128xf32>
    %28 = vector.extract_strided_slice %16 {offsets = [0, 128], sizes = [8, 128], strides = [1, 1]} : vector<8x384xf32> to vector<8x128xf32>
    %29 = vector.extract_strided_slice %19 {offsets = [0, 128], sizes = [8, 128], strides = [1, 1]} : vector<8x384xf32> to vector<8x128xf32>
    %30 = arith.addf %28, %29 : vector<8x128xf32>
    %31 = arith.negf %30 : vector<8x128xf32>
    %32 = math.exp %31 : vector<8x128xf32>
    %cst_18 = arith.constant 1.000000e+00 : f32
    %33 = vector.broadcast %cst_18 : f32 to vector<8x128xf32>
    %34 = arith.addf %33, %32 : vector<8x128xf32>
    %35 = arith.divf %33, %34 : vector<8x128xf32>
    %36 = vector.extract_strided_slice %16 {offsets = [0, 256], sizes = [8, 128], strides = [1, 1]} : vector<8x384xf32> to vector<8x128xf32>
    %37 = vector.extract_strided_slice %19 {offsets = [0, 256], sizes = [8, 128], strides = [1, 1]} : vector<8x384xf32> to vector<8x128xf32>
    %38 = arith.mulf %27, %37 : vector<8x128xf32>
    %39 = arith.addf %36, %38 : vector<8x128xf32>
    %40 = math.tanh %39 : vector<8x128xf32>
    %cst_19 = arith.constant 1.000000e+00 : f32
    %41 = vector.broadcast %cst_19 : f32 to vector<8x128xf32>
    %42 = arith.subf %41, %35 : vector<8x128xf32>
    %43 = arith.mulf %42, %40 : vector<8x128xf32>
    %44 = arith.mulf %35, %14 : vector<8x128xf32>
    %45 = arith.addf %43, %44 : vector<8x128xf32>
    %46 = arith.truncf %45 : vector<8x128xf32> to vector<8x128xbf16>
    %c0_20 = arith.constant 0 : index
    %c0_21 = arith.constant 0 : index
    %47 = vector.load %arg6[%c0_20, %c0_21] : memref<32x128xbf16, #tpu.memory_space<vmem>>, vector<8x128xbf16>
    tpu.vector_store %arg6[%c0_20, %c0_21], %46 {strides = array<i32>} : memref<32x128xbf16, #tpu.memory_space<vmem>>, vector<8x128xbf16>,
    %c8 = arith.constant 8 : index
    %c0_22 = arith.constant 0 : index
    %48 = vector.load %arg8[%c8, %c0_22] : memref<32x384xf32, #tpu.memory_space<vmem>>, vector<8x384xf32>
    %49 = arith.addf %48, %10 : vector<8x384xf32>
    %50 = arith.truncf %45 : vector<8x128xf32> to vector<8x128xbf16>
    %cst_23 = arith.constant dense<0.000000e+00> : vector<8x384xf32>
    %51 = tpu.matmul %50, %7, %cst_23 {dimension_numbers = #tpu.dot_dimension_numbers<[1], [0], [0], [1], [0, 0, 1, 1], [], []>} : vector<8x128xbf16>, vector<128x384xbf16>, vector<8x384xf32> -> vector<8x384xf32>
    %52 = arith.addf %51, %13 : vector<8x384xf32>
    %53 = vector.extract_strided_slice %49 {offsets = [0, 0], sizes = [8, 128], strides = [1, 1]} : vector<8x384xf32> to vector<8x128xf32>
    %54 = vector.extract_strided_slice %52 {offsets = [0, 0], sizes = [8, 128], strides = [1, 1]} : vector<8x384xf32> to vector<8x128xf32>
    %55 = arith.addf %53, %54 : vector<8x128xf32>
    %56 = arith.negf %55 : vector<8x128xf32>
    %57 = math.exp %56 : vector<8x128xf32>
    %cst_24 = arith.constant 1.000000e+00 : f32
    %58 = vector.broadcast %cst_24 : f32 to vector<8x128xf32>
    %59 = arith.addf %58, %57 : vector<8x128xf32>
    %60 = arith.divf %58, %59 : vector<8x128xf32>
    %61 = vector.extract_strided_slice %49 {offsets = [0, 128], sizes = [8, 128], strides = [1, 1]} : vector<8x384xf32> to vector<8x128xf32>
    %62 = vector.extract_strided_slice %52 {offsets = [0, 128], sizes = [8, 128], strides = [1, 1]} : vector<8x384xf32> to vector<8x128xf32>
    %63 = arith.addf %61, %62 : vector<8x128xf32>
    %64 = arith.negf %63 : vector<8x128xf32>
    %65 = math.exp %64 : vector<8x128xf32>
    %cst_25 = arith.constant 1.000000e+00 : f32
    %66 = vector.broadcast %cst_25 : f32 to vector<8x128xf32>
    %67 = arith.addf %66, %65 : vector<8x128xf32>
    %68 = arith.divf %66, %67 : vector<8x128xf32>
    %69 = vector.extract_strided_slice %49 {offsets = [0, 256], sizes = [8, 128], strides = [1, 1]} : vector<8x384xf32> to vector<8x128xf32>
    %70 = vector.extract_strided_slice %52 {offsets = [0, 256], sizes = [8, 128], strides = [1, 1]} : vector<8x384xf32> to vector<8x128xf32>
    %71 = arith.mulf %60, %70 : vector<8x128xf32>
    %72 = arith.addf %69, %71 : vector<8x128xf32>
    %73 = math.tanh %72 : vector<8x128xf32>
    %cst_26 = arith.constant 1.000000e+00 : f32
    %74 = vector.broadcast %cst_26 : f32 to vector<8x128xf32>
    %75 = arith.subf %74, %68 : vector<8x128xf32>
    %76 = arith.mulf %75, %73 : vector<8x128xf32>
    %77 = arith.mulf %68, %45 : vector<8x128xf32>
    %78 = arith.addf %76, %77 : vector<8x128xf32>
    %79 = arith.truncf %78 : vector<8x128xf32> to vector<8x128xbf16>
    %c8_27 = arith.constant 8 : index
    %c0_28 = arith.constant 0 : index
    %80 = vector.load %arg6[%c8_27, %c0_28] : memref<32x128xbf16, #tpu.memory_space<vmem>>, vector<8x128xbf16>
    tpu.vector_store %arg6[%c8_27, %c0_28], %79 {strides = array<i32>} : memref<32x128xbf16, #tpu.memory_space<vmem>>, vector<8x128xbf16>,
    %c16 = arith.constant 16 : index
    %c0_29 = arith.constant 0 : index
    %81 = vector.load %arg8[%c16, %c0_29] : memref<32x384xf32, #tpu.memory_space<vmem>>, vector<8x384xf32>
    %82 = arith.addf %81, %10 : vector<8x384xf32>
    %83 = arith.truncf %78 : vector<8x128xf32> to vector<8x128xbf16>
    %cst_30 = arith.constant dense<0.000000e+00> : vector<8x384xf32>
    %84 = tpu.matmul %83, %7, %cst_30 {dimension_numbers = #tpu.dot_dimension_numbers<[1], [0], [0], [1], [0, 0, 1, 1], [], []>} : vector<8x128xbf16>, vector<128x384xbf16>, vector<8x384xf32> -> vector<8x384xf32>
    %85 = arith.addf %84, %13 : vector<8x384xf32>
    %86 = vector.extract_strided_slice %82 {offsets = [0, 0], sizes = [8, 128], strides = [1, 1]} : vector<8x384xf32> to vector<8x128xf32>
    %87 = vector.extract_strided_slice %85 {offsets = [0, 0], sizes = [8, 128], strides = [1, 1]} : vector<8x384xf32> to vector<8x128xf32>
    %88 = arith.addf %86, %87 : vector<8x128xf32>
    %89 = arith.negf %88 : vector<8x128xf32>
    %90 = math.exp %89 : vector<8x128xf32>
    %cst_31 = arith.constant 1.000000e+00 : f32
    %91 = vector.broadcast %cst_31 : f32 to vector<8x128xf32>
    %92 = arith.addf %91, %90 : vector<8x128xf32>
    %93 = arith.divf %91, %92 : vector<8x128xf32>
    %94 = vector.extract_strided_slice %82 {offsets = [0, 128], sizes = [8, 128], strides = [1, 1]} : vector<8x384xf32> to vector<8x128xf32>
    %95 = vector.extract_strided_slice %85 {offsets = [0, 128], sizes = [8, 128], strides = [1, 1]} : vector<8x384xf32> to vector<8x128xf32>
    %96 = arith.addf %94, %95 : vector<8x128xf32>
    %97 = arith.negf %96 : vector<8x128xf32>
    %98 = math.exp %97 : vector<8x128xf32>
    %cst_32 = arith.constant 1.000000e+00 : f32
    %99 = vector.broadcast %cst_32 : f32 to vector<8x128xf32>
    %100 = arith.addf %99, %98 : vector<8x128xf32>
    %101 = arith.divf %99, %100 : vector<8x128xf32>
    %102 = vector.extract_strided_slice %82 {offsets = [0, 256], sizes = [8, 128], strides = [1, 1]} : vector<8x384xf32> to vector<8x128xf32>
    %103 = vector.extract_strided_slice %85 {offsets = [0, 256], sizes = [8, 128], strides = [1, 1]} : vector<8x384xf32> to vector<8x128xf32>
    %104 = arith.mulf %93, %103 : vector<8x128xf32>
    %105 = arith.addf %102, %104 : vector<8x128xf32>
    %106 = math.tanh %105 : vector<8x128xf32>
    %cst_33 = arith.constant 1.000000e+00 : f32
    %107 = vector.broadcast %cst_33 : f32 to vector<8x128xf32>
    %108 = arith.subf %107, %101 : vector<8x128xf32>
    %109 = arith.mulf %108, %106 : vector<8x128xf32>
    %110 = arith.mulf %101, %78 : vector<8x128xf32>
    %111 = arith.addf %109, %110 : vector<8x128xf32>
    %112 = arith.truncf %111 : vector<8x128xf32> to vector<8x128xbf16>
    %c16_34 = arith.constant 16 : index
    %c0_35 = arith.constant 0 : index
    %113 = vector.load %arg6[%c16_34, %c0_35] : memref<32x128xbf16, #tpu.memory_space<vmem>>, vector<8x128xbf16>
    tpu.vector_store %arg6[%c16_34, %c0_35], %112 {strides = array<i32>} : memref<32x128xbf16, #tpu.memory_space<vmem>>, vector<8x128xbf16>,
    %c24 = arith.constant 24 : index
    %c0_36 = arith.constant 0 : index
    %114 = vector.load %arg8[%c24, %c0_36] : memref<32x384xf32, #tpu.memory_space<vmem>>, vector<8x384xf32>
    %115 = arith.addf %114, %10 : vector<8x384xf32>
    %116 = arith.truncf %111 : vector<8x128xf32> to vector<8x128xbf16>
    %cst_37 = arith.constant dense<0.000000e+00> : vector<8x384xf32>
    %117 = tpu.matmul %116, %7, %cst_37 {dimension_numbers = #tpu.dot_dimension_numbers<[1], [0], [0], [1], [0, 0, 1, 1], [], []>} : vector<8x128xbf16>, vector<128x384xbf16>, vector<8x384xf32> -> vector<8x384xf32>
    %118 = arith.addf %117, %13 : vector<8x384xf32>
    %119 = vector.extract_strided_slice %115 {offsets = [0, 0], sizes = [8, 128], strides = [1, 1]} : vector<8x384xf32> to vector<8x128xf32>
    %120 = vector.extract_strided_slice %118 {offsets = [0, 0], sizes = [8, 128], strides = [1, 1]} : vector<8x384xf32> to vector<8x128xf32>
    %121 = arith.addf %119, %120 : vector<8x128xf32>
    %122 = arith.negf %121 : vector<8x128xf32>
    %123 = math.exp %122 : vector<8x128xf32>
    %cst_38 = arith.constant 1.000000e+00 : f32
    %124 = vector.broadcast %cst_38 : f32 to vector<8x128xf32>
    %125 = arith.addf %124, %123 : vector<8x128xf32>
    %126 = arith.divf %124, %125 : vector<8x128xf32>
    %127 = vector.extract_strided_slice %115 {offsets = [0, 128], sizes = [8, 128], strides = [1, 1]} : vector<8x384xf32> to vector<8x128xf32>
    %128 = vector.extract_strided_slice %118 {offsets = [0, 128], sizes = [8, 128], strides = [1, 1]} : vector<8x384xf32> to vector<8x128xf32>
    %129 = arith.addf %127, %128 : vector<8x128xf32>
    %130 = arith.negf %129 : vector<8x128xf32>
    %131 = math.exp %130 : vector<8x128xf32>
    %cst_39 = arith.constant 1.000000e+00 : f32
    %132 = vector.broadcast %cst_39 : f32 to vector<8x128xf32>
    %133 = arith.addf %132, %131 : vector<8x128xf32>
    %134 = arith.divf %132, %133 : vector<8x128xf32>
    %135 = vector.extract_strided_slice %115 {offsets = [0, 256], sizes = [8, 128], strides = [1, 1]} : vector<8x384xf32> to vector<8x128xf32>
    %136 = vector.extract_strided_slice %118 {offsets = [0, 256], sizes = [8, 128], strides = [1, 1]} : vector<8x384xf32> to vector<8x128xf32>
    %137 = arith.mulf %126, %136 : vector<8x128xf32>
    %138 = arith.addf %135, %137 : vector<8x128xf32>
    %139 = math.tanh %138 : vector<8x128xf32>
    %cst_40 = arith.constant 1.000000e+00 : f32
    %140 = vector.broadcast %cst_40 : f32 to vector<8x128xf32>
    %141 = arith.subf %140, %134 : vector<8x128xf32>
    %142 = arith.mulf %141, %139 : vector<8x128xf32>
    %143 = arith.mulf %134, %111 : vector<8x128xf32>
    %144 = arith.addf %142, %143 : vector<8x128xf32>
    %145 = arith.truncf %144 : vector<8x128xf32> to vector<8x128xbf16>
    %c24_41 = arith.constant 24 : index
    %c0_42 = arith.constant 0 : index
    %146 = vector.load %arg6[%c24_41, %c0_42] : memref<32x128xbf16, #tpu.memory_space<vmem>>, vector<8x128xbf16>
    tpu.vector_store %arg6[%c24_41, %c0_42], %145 {strides = array<i32>} : memref<32x128xbf16, #tpu.memory_space<vmem>>, vector<8x128xbf16>,
    %c0_43 = arith.constant 0 : index
    %c0_44 = arith.constant 0 : index
    %147 = vector.load %arg7[%c0_43, %c0_44] : memref<8x128xf32, #tpu.memory_space<vmem>>, vector<8x128xf32>
    tpu.vector_store %arg7[%c0_43, %c0_44], %144 {strides = array<i32>} : memref<8x128xf32, #tpu.memory_space<vmem>>, vector<8x128xf32>,
    return
  }
  func.func @transform_0(%arg0: i32) -> (i32, i32) {
    %c0_i32 = arith.constant 0 : i32
    %c0_i32_0 = arith.constant 0 : i32
    return %arg0, %c0_i32 : i32, i32
  }
  func.func @transform_1(%arg0: i32) -> (i32, i32) {
    %c0_i32 = arith.constant 0 : i32
    %c0_i32_0 = arith.constant 0 : i32
    %c0_i32_1 = arith.constant 0 : i32
    return %c0_i32, %c0_i32_0 : i32, i32
  }
  func.func @transform_2(%arg0: i32) -> (i32, i32) {
    %c0_i32 = arith.constant 0 : i32
    %c0_i32_0 = arith.constant 0 : i32
    %c0_i32_1 = arith.constant 0 : i32
    return %c0_i32, %c0_i32_0 : i32, i32
  }
  func.func @transform_3(%arg0: i32) -> (i32, i32) {
    %c0_i32 = arith.constant 0 : i32
    %c0_i32_0 = arith.constant 0 : i32
    %c0_i32_1 = arith.constant 0 : i32
    return %c0_i32, %c0_i32_0 : i32, i32
  }
  func.func @transform_4(%arg0: i32) -> (i32, i32) {
    %c0_i32 = arith.constant 0 : i32
    %c0_i32_0 = arith.constant 0 : i32
    %c0_i32_1 = arith.constant 0 : i32
    return %c0_i32, %c0_i32_0 : i32, i32
  }
  func.func @transform_5(%arg0: i32) -> (i32, i32) {
    %c0_i32 = arith.constant 0 : i32
    %c0_i32_0 = arith.constant 0 : i32
    return %arg0, %c0_i32 : i32, i32
  }
}

module attributes {stable_mosaic.version = 11 : i64} {
  func.func @_gru_last_fc_kernel(%arg0: i32, %arg1: memref<32x128xbf16, #tpu.memory_space<vmem>>, %arg2: memref<128x384xbf16, #tpu.memory_space<vmem>>, %arg3: memref<128x384xbf16, #tpu.memory_space<vmem>>, %arg4: memref<1x384xf32, #tpu.memory_space<vmem>>, %arg5: memref<1x384xf32, #tpu.memory_space<vmem>>, %arg6: memref<128x128xbf16, #tpu.memory_space<vmem>>, %arg7: memref<1x128xf32, #tpu.memory_space<vmem>>, %arg8: memref<8x128xf32, #tpu.memory_space<vmem>>, %arg9: memref<8x128xf32, #tpu.memory_space<vmem>>, %arg10: memref<32x384xf32, #tpu.memory_space<vmem>>) attributes {dimension_semantics = [#tpu.dimension_semantics<arbitrary>], iteration_bounds = array<i64: 2>, scalar_prefetch = 0 : i64, scratch_operands = 2 : i64, tpu.core_type = #tpu.core_type<tc>, window_params = [{transform_indices = @transform_0, window_bounds = array<i64: 32, 128>}, {pipeline_mode = #tpu.pipeline_mode<synchronous>, transform_indices = @transform_1, window_bounds = array<i64: 128, 384>}, {pipeline_mode = #tpu.pipeline_mode<synchronous>, transform_indices = @transform_2, window_bounds = array<i64: 128, 384>}, {pipeline_mode = #tpu.pipeline_mode<synchronous>, transform_indices = @transform_3, window_bounds = array<i64: 1, 384>}, {pipeline_mode = #tpu.pipeline_mode<synchronous>, transform_indices = @transform_4, window_bounds = array<i64: 1, 384>}, {pipeline_mode = #tpu.pipeline_mode<synchronous>, transform_indices = @transform_5, window_bounds = array<i64: 128, 128>}, {pipeline_mode = #tpu.pipeline_mode<synchronous>, transform_indices = @transform_6, window_bounds = array<i64: 1, 128>}, {pipeline_mode = #tpu.pipeline_mode<synchronous>, transform_indices = @transform_7, window_bounds = array<i64: 8, 128>}]} {
    %c0_i32 = arith.constant 0 : i32
    %0 = arith.cmpi eq, %arg0, %c0_i32 : i32
    %1 = arith.extui %0 : i1 to i32
    %c0_i32_0 = arith.constant 0 : i32
    %2 = arith.cmpi ne, %1, %c0_i32_0 : i32
    scf.if %2 {
      %cst_38 = arith.constant 0.000000e+00 : f32
      %143 = vector.broadcast %cst_38 : f32 to vector<8x128xf32>
      %c0_39 = arith.constant 0 : index
      %c0_40 = arith.constant 0 : index
      %144 = vector.load %arg9[%c0_39, %c0_40] : memref<8x128xf32, #tpu.memory_space<vmem>>, vector<8x128xf32>
      tpu.vector_store %arg9[%c0_39, %c0_40], %143 {strides = array<i32>} : memref<8x128xf32, #tpu.memory_space<vmem>>, vector<8x128xf32>,
    } else {
    }
    %c0 = arith.constant 0 : index
    %c0_1 = arith.constant 0 : index
    %3 = vector.load %arg1[%c0, %c0_1] : memref<32x128xbf16, #tpu.memory_space<vmem>>, vector<32x128xbf16>
    %c0_2 = arith.constant 0 : index
    %c0_3 = arith.constant 0 : index
    %4 = vector.load %arg2[%c0_2, %c0_3] : memref<128x384xbf16, #tpu.memory_space<vmem>>, vector<128x384xbf16>
    %cst = arith.constant dense<0.000000e+00> : vector<32x384xf32>
    %5 = tpu.matmul %3, %4, %cst {dimension_numbers = #tpu.dot_dimension_numbers<[1], [0], [0], [1], [0, 0, 1, 1], [], []>} : vector<32x128xbf16>, vector<128x384xbf16>, vector<32x384xf32> -> vector<32x384xf32>
    %c0_4 = arith.constant 0 : index
    %c0_5 = arith.constant 0 : index
    %6 = vector.load %arg10[%c0_4, %c0_5] : memref<32x384xf32, #tpu.memory_space<vmem>>, vector<32x384xf32>
    tpu.vector_store %arg10[%c0_4, %c0_5], %5 {strides = array<i32>} : memref<32x384xf32, #tpu.memory_space<vmem>>, vector<32x384xf32>,
    %c0_6 = arith.constant 0 : index
    %c0_7 = arith.constant 0 : index
    %7 = vector.load %arg3[%c0_6, %c0_7] : memref<128x384xbf16, #tpu.memory_space<vmem>>, vector<128x384xbf16>
    %c0_8 = arith.constant 0 : index
    %c0_9 = arith.constant 0 : index
    %8 = vector.load %arg4[%c0_8, %c0_9] : memref<1x384xf32, #tpu.memory_space<vmem>>, vector<1x384xf32>
    %9 = vector.shape_cast %8 : vector<1x384xf32> to vector<1x384xf32>
    %10 = vector.broadcast %9 : vector<1x384xf32> to vector<8x384xf32>
    %c0_10 = arith.constant 0 : index
    %c0_11 = arith.constant 0 : index
    %11 = vector.load %arg5[%c0_10, %c0_11] : memref<1x384xf32, #tpu.memory_space<vmem>>, vector<1x384xf32>
    %12 = vector.shape_cast %11 : vector<1x384xf32> to vector<1x384xf32>
    %13 = vector.broadcast %12 : vector<1x384xf32> to vector<8x384xf32>
    %c0_12 = arith.constant 0 : index
    %c0_13 = arith.constant 0 : index
    %14 = vector.load %arg9[%c0_12, %c0_13] : memref<8x128xf32, #tpu.memory_space<vmem>>, vector<8x128xf32>
    %c0_14 = arith.constant 0 : index
    %c0_15 = arith.constant 0 : index
    %15 = vector.load %arg10[%c0_14, %c0_15] : memref<32x384xf32, #tpu.memory_space<vmem>>, vector<8x384xf32>
    %16 = arith.addf %15, %10 : vector<8x384xf32>
    %17 = arith.truncf %14 : vector<8x128xf32> to vector<8x128xbf16>
    %cst_16 = arith.constant dense<0.000000e+00> : vector<8x384xf32>
    %18 = tpu.matmul %17, %7, %cst_16 {dimension_numbers = #tpu.dot_dimension_numbers<[1], [0], [0], [1], [0, 0, 1, 1], [], []>} : vector<8x128xbf16>, vector<128x384xbf16>, vector<8x384xf32> -> vector<8x384xf32>
    %19 = arith.addf %18, %13 : vector<8x384xf32>
    %20 = vector.extract_strided_slice %16 {offsets = [0, 0], sizes = [8, 128], strides = [1, 1]} : vector<8x384xf32> to vector<8x128xf32>
    %21 = vector.extract_strided_slice %19 {offsets = [0, 0], sizes = [8, 128], strides = [1, 1]} : vector<8x384xf32> to vector<8x128xf32>
    %22 = arith.addf %20, %21 : vector<8x128xf32>
    %23 = arith.negf %22 : vector<8x128xf32>
    %24 = math.exp %23 : vector<8x128xf32>
    %cst_17 = arith.constant 1.000000e+00 : f32
    %25 = vector.broadcast %cst_17 : f32 to vector<8x128xf32>
    %26 = arith.addf %25, %24 : vector<8x128xf32>
    %27 = arith.divf %25, %26 : vector<8x128xf32>
    %28 = vector.extract_strided_slice %16 {offsets = [0, 128], sizes = [8, 128], strides = [1, 1]} : vector<8x384xf32> to vector<8x128xf32>
    %29 = vector.extract_strided_slice %19 {offsets = [0, 128], sizes = [8, 128], strides = [1, 1]} : vector<8x384xf32> to vector<8x128xf32>
    %30 = arith.addf %28, %29 : vector<8x128xf32>
    %31 = arith.negf %30 : vector<8x128xf32>
    %32 = math.exp %31 : vector<8x128xf32>
    %cst_18 = arith.constant 1.000000e+00 : f32
    %33 = vector.broadcast %cst_18 : f32 to vector<8x128xf32>
    %34 = arith.addf %33, %32 : vector<8x128xf32>
    %35 = arith.divf %33, %34 : vector<8x128xf32>
    %36 = vector.extract_strided_slice %16 {offsets = [0, 256], sizes = [8, 128], strides = [1, 1]} : vector<8x384xf32> to vector<8x128xf32>
    %37 = vector.extract_strided_slice %19 {offsets = [0, 256], sizes = [8, 128], strides = [1, 1]} : vector<8x384xf32> to vector<8x128xf32>
    %38 = arith.mulf %27, %37 : vector<8x128xf32>
    %39 = arith.addf %36, %38 : vector<8x128xf32>
    %40 = math.tanh %39 : vector<8x128xf32>
    %cst_19 = arith.constant 1.000000e+00 : f32
    %41 = vector.broadcast %cst_19 : f32 to vector<8x128xf32>
    %42 = arith.subf %41, %35 : vector<8x128xf32>
    %43 = arith.mulf %42, %40 : vector<8x128xf32>
    %44 = arith.mulf %35, %14 : vector<8x128xf32>
    %45 = arith.addf %43, %44 : vector<8x128xf32>
    %c8 = arith.constant 8 : index
    %c0_20 = arith.constant 0 : index
    %46 = vector.load %arg10[%c8, %c0_20] : memref<32x384xf32, #tpu.memory_space<vmem>>, vector<8x384xf32>
    %47 = arith.addf %46, %10 : vector<8x384xf32>
    %48 = arith.truncf %45 : vector<8x128xf32> to vector<8x128xbf16>
    %cst_21 = arith.constant dense<0.000000e+00> : vector<8x384xf32>
    %49 = tpu.matmul %48, %7, %cst_21 {dimension_numbers = #tpu.dot_dimension_numbers<[1], [0], [0], [1], [0, 0, 1, 1], [], []>} : vector<8x128xbf16>, vector<128x384xbf16>, vector<8x384xf32> -> vector<8x384xf32>
    %50 = arith.addf %49, %13 : vector<8x384xf32>
    %51 = vector.extract_strided_slice %47 {offsets = [0, 0], sizes = [8, 128], strides = [1, 1]} : vector<8x384xf32> to vector<8x128xf32>
    %52 = vector.extract_strided_slice %50 {offsets = [0, 0], sizes = [8, 128], strides = [1, 1]} : vector<8x384xf32> to vector<8x128xf32>
    %53 = arith.addf %51, %52 : vector<8x128xf32>
    %54 = arith.negf %53 : vector<8x128xf32>
    %55 = math.exp %54 : vector<8x128xf32>
    %cst_22 = arith.constant 1.000000e+00 : f32
    %56 = vector.broadcast %cst_22 : f32 to vector<8x128xf32>
    %57 = arith.addf %56, %55 : vector<8x128xf32>
    %58 = arith.divf %56, %57 : vector<8x128xf32>
    %59 = vector.extract_strided_slice %47 {offsets = [0, 128], sizes = [8, 128], strides = [1, 1]} : vector<8x384xf32> to vector<8x128xf32>
    %60 = vector.extract_strided_slice %50 {offsets = [0, 128], sizes = [8, 128], strides = [1, 1]} : vector<8x384xf32> to vector<8x128xf32>
    %61 = arith.addf %59, %60 : vector<8x128xf32>
    %62 = arith.negf %61 : vector<8x128xf32>
    %63 = math.exp %62 : vector<8x128xf32>
    %cst_23 = arith.constant 1.000000e+00 : f32
    %64 = vector.broadcast %cst_23 : f32 to vector<8x128xf32>
    %65 = arith.addf %64, %63 : vector<8x128xf32>
    %66 = arith.divf %64, %65 : vector<8x128xf32>
    %67 = vector.extract_strided_slice %47 {offsets = [0, 256], sizes = [8, 128], strides = [1, 1]} : vector<8x384xf32> to vector<8x128xf32>
    %68 = vector.extract_strided_slice %50 {offsets = [0, 256], sizes = [8, 128], strides = [1, 1]} : vector<8x384xf32> to vector<8x128xf32>
    %69 = arith.mulf %58, %68 : vector<8x128xf32>
    %70 = arith.addf %67, %69 : vector<8x128xf32>
    %71 = math.tanh %70 : vector<8x128xf32>
    %cst_24 = arith.constant 1.000000e+00 : f32
    %72 = vector.broadcast %cst_24 : f32 to vector<8x128xf32>
    %73 = arith.subf %72, %66 : vector<8x128xf32>
    %74 = arith.mulf %73, %71 : vector<8x128xf32>
    %75 = arith.mulf %66, %45 : vector<8x128xf32>
    %76 = arith.addf %74, %75 : vector<8x128xf32>
    %c16 = arith.constant 16 : index
    %c0_25 = arith.constant 0 : index
    %77 = vector.load %arg10[%c16, %c0_25] : memref<32x384xf32, #tpu.memory_space<vmem>>, vector<8x384xf32>
    %78 = arith.addf %77, %10 : vector<8x384xf32>
    %79 = arith.truncf %76 : vector<8x128xf32> to vector<8x128xbf16>
    %cst_26 = arith.constant dense<0.000000e+00> : vector<8x384xf32>
    %80 = tpu.matmul %79, %7, %cst_26 {dimension_numbers = #tpu.dot_dimension_numbers<[1], [0], [0], [1], [0, 0, 1, 1], [], []>} : vector<8x128xbf16>, vector<128x384xbf16>, vector<8x384xf32> -> vector<8x384xf32>
    %81 = arith.addf %80, %13 : vector<8x384xf32>
    %82 = vector.extract_strided_slice %78 {offsets = [0, 0], sizes = [8, 128], strides = [1, 1]} : vector<8x384xf32> to vector<8x128xf32>
    %83 = vector.extract_strided_slice %81 {offsets = [0, 0], sizes = [8, 128], strides = [1, 1]} : vector<8x384xf32> to vector<8x128xf32>
    %84 = arith.addf %82, %83 : vector<8x128xf32>
    %85 = arith.negf %84 : vector<8x128xf32>
    %86 = math.exp %85 : vector<8x128xf32>
    %cst_27 = arith.constant 1.000000e+00 : f32
    %87 = vector.broadcast %cst_27 : f32 to vector<8x128xf32>
    %88 = arith.addf %87, %86 : vector<8x128xf32>
    %89 = arith.divf %87, %88 : vector<8x128xf32>
    %90 = vector.extract_strided_slice %78 {offsets = [0, 128], sizes = [8, 128], strides = [1, 1]} : vector<8x384xf32> to vector<8x128xf32>
    %91 = vector.extract_strided_slice %81 {offsets = [0, 128], sizes = [8, 128], strides = [1, 1]} : vector<8x384xf32> to vector<8x128xf32>
    %92 = arith.addf %90, %91 : vector<8x128xf32>
    %93 = arith.negf %92 : vector<8x128xf32>
    %94 = math.exp %93 : vector<8x128xf32>
    %cst_28 = arith.constant 1.000000e+00 : f32
    %95 = vector.broadcast %cst_28 : f32 to vector<8x128xf32>
    %96 = arith.addf %95, %94 : vector<8x128xf32>
    %97 = arith.divf %95, %96 : vector<8x128xf32>
    %98 = vector.extract_strided_slice %78 {offsets = [0, 256], sizes = [8, 128], strides = [1, 1]} : vector<8x384xf32> to vector<8x128xf32>
    %99 = vector.extract_strided_slice %81 {offsets = [0, 256], sizes = [8, 128], strides = [1, 1]} : vector<8x384xf32> to vector<8x128xf32>
    %100 = arith.mulf %89, %99 : vector<8x128xf32>
    %101 = arith.addf %98, %100 : vector<8x128xf32>
    %102 = math.tanh %101 : vector<8x128xf32>
    %cst_29 = arith.constant 1.000000e+00 : f32
    %103 = vector.broadcast %cst_29 : f32 to vector<8x128xf32>
    %104 = arith.subf %103, %97 : vector<8x128xf32>
    %105 = arith.mulf %104, %102 : vector<8x128xf32>
    %106 = arith.mulf %97, %76 : vector<8x128xf32>
    %107 = arith.addf %105, %106 : vector<8x128xf32>
    %c24 = arith.constant 24 : index
    %c0_30 = arith.constant 0 : index
    %108 = vector.load %arg10[%c24, %c0_30] : memref<32x384xf32, #tpu.memory_space<vmem>>, vector<8x384xf32>
    %109 = arith.addf %108, %10 : vector<8x384xf32>
    %110 = arith.truncf %107 : vector<8x128xf32> to vector<8x128xbf16>
    %cst_31 = arith.constant dense<0.000000e+00> : vector<8x384xf32>
    %111 = tpu.matmul %110, %7, %cst_31 {dimension_numbers = #tpu.dot_dimension_numbers<[1], [0], [0], [1], [0, 0, 1, 1], [], []>} : vector<8x128xbf16>, vector<128x384xbf16>, vector<8x384xf32> -> vector<8x384xf32>
    %112 = arith.addf %111, %13 : vector<8x384xf32>
    %113 = vector.extract_strided_slice %109 {offsets = [0, 0], sizes = [8, 128], strides = [1, 1]} : vector<8x384xf32> to vector<8x128xf32>
    %114 = vector.extract_strided_slice %112 {offsets = [0, 0], sizes = [8, 128], strides = [1, 1]} : vector<8x384xf32> to vector<8x128xf32>
    %115 = arith.addf %113, %114 : vector<8x128xf32>
    %116 = arith.negf %115 : vector<8x128xf32>
    %117 = math.exp %116 : vector<8x128xf32>
    %cst_32 = arith.constant 1.000000e+00 : f32
    %118 = vector.broadcast %cst_32 : f32 to vector<8x128xf32>
    %119 = arith.addf %118, %117 : vector<8x128xf32>
    %120 = arith.divf %118, %119 : vector<8x128xf32>
    %121 = vector.extract_strided_slice %109 {offsets = [0, 128], sizes = [8, 128], strides = [1, 1]} : vector<8x384xf32> to vector<8x128xf32>
    %122 = vector.extract_strided_slice %112 {offsets = [0, 128], sizes = [8, 128], strides = [1, 1]} : vector<8x384xf32> to vector<8x128xf32>
    %123 = arith.addf %121, %122 : vector<8x128xf32>
    %124 = arith.negf %123 : vector<8x128xf32>
    %125 = math.exp %124 : vector<8x128xf32>
    %cst_33 = arith.constant 1.000000e+00 : f32
    %126 = vector.broadcast %cst_33 : f32 to vector<8x128xf32>
    %127 = arith.addf %126, %125 : vector<8x128xf32>
    %128 = arith.divf %126, %127 : vector<8x128xf32>
    %129 = vector.extract_strided_slice %109 {offsets = [0, 256], sizes = [8, 128], strides = [1, 1]} : vector<8x384xf32> to vector<8x128xf32>
    %130 = vector.extract_strided_slice %112 {offsets = [0, 256], sizes = [8, 128], strides = [1, 1]} : vector<8x384xf32> to vector<8x128xf32>
    %131 = arith.mulf %120, %130 : vector<8x128xf32>
    %132 = arith.addf %129, %131 : vector<8x128xf32>
    %133 = math.tanh %132 : vector<8x128xf32>
    %cst_34 = arith.constant 1.000000e+00 : f32
    %134 = vector.broadcast %cst_34 : f32 to vector<8x128xf32>
    %135 = arith.subf %134, %128 : vector<8x128xf32>
    %136 = arith.mulf %135, %133 : vector<8x128xf32>
    %137 = arith.mulf %128, %107 : vector<8x128xf32>
    %138 = arith.addf %136, %137 : vector<8x128xf32>
    %c0_35 = arith.constant 0 : index
    %c0_36 = arith.constant 0 : index
    %139 = vector.load %arg9[%c0_35, %c0_36] : memref<8x128xf32, #tpu.memory_space<vmem>>, vector<8x128xf32>
    tpu.vector_store %arg9[%c0_35, %c0_36], %138 {strides = array<i32>} : memref<8x128xf32, #tpu.memory_space<vmem>>, vector<8x128xf32>,
    %c1_i32 = arith.constant 1 : i32
    %140 = arith.cmpi eq, %arg0, %c1_i32 : i32
    %141 = arith.extui %140 : i1 to i32
    %c0_i32_37 = arith.constant 0 : i32
    %142 = arith.cmpi ne, %141, %c0_i32_37 : i32
    scf.if %142 {
      %c0_38 = arith.constant 0 : index
      %c0_39 = arith.constant 0 : index
      %143 = vector.load %arg9[%c0_38, %c0_39] : memref<8x128xf32, #tpu.memory_space<vmem>>, vector<8x128xf32>
      %144 = arith.truncf %143 : vector<8x128xf32> to vector<8x128xbf16>
      %c0_40 = arith.constant 0 : index
      %c0_41 = arith.constant 0 : index
      %145 = vector.load %arg6[%c0_40, %c0_41] : memref<128x128xbf16, #tpu.memory_space<vmem>>, vector<128x128xbf16>
      %cst_42 = arith.constant dense<0.000000e+00> : vector<8x128xf32>
      %146 = tpu.matmul %144, %145, %cst_42 {dimension_numbers = #tpu.dot_dimension_numbers<[1], [0], [0], [1], [0, 0, 1, 1], [], []>} : vector<8x128xbf16>, vector<128x128xbf16>, vector<8x128xf32> -> vector<8x128xf32>
      %c0_43 = arith.constant 0 : index
      %c0_44 = arith.constant 0 : index
      %147 = vector.load %arg7[%c0_43, %c0_44] : memref<1x128xf32, #tpu.memory_space<vmem>>, vector<1x128xf32>
      %148 = vector.broadcast %147 : vector<1x128xf32> to vector<8x128xf32>
      %149 = arith.addf %146, %148 : vector<8x128xf32>
      %c0_45 = arith.constant 0 : index
      %c0_46 = arith.constant 0 : index
      %150 = vector.load %arg8[%c0_45, %c0_46] : memref<8x128xf32, #tpu.memory_space<vmem>>, vector<8x128xf32>
      tpu.vector_store %arg8[%c0_45, %c0_46], %149 {strides = array<i32>} : memref<8x128xf32, #tpu.memory_space<vmem>>, vector<8x128xf32>,
    } else {
    }
    return
  }
  func.func @transform_0(%arg0: i32) -> (i32, i32) {
    %c0_i32 = arith.constant 0 : i32
    %c0_i32_0 = arith.constant 0 : i32
    return %arg0, %c0_i32 : i32, i32
  }
  func.func @transform_1(%arg0: i32) -> (i32, i32) {
    %c0_i32 = arith.constant 0 : i32
    %c0_i32_0 = arith.constant 0 : i32
    %c0_i32_1 = arith.constant 0 : i32
    return %c0_i32, %c0_i32_0 : i32, i32
  }
  func.func @transform_2(%arg0: i32) -> (i32, i32) {
    %c0_i32 = arith.constant 0 : i32
    %c0_i32_0 = arith.constant 0 : i32
    %c0_i32_1 = arith.constant 0 : i32
    return %c0_i32, %c0_i32_0 : i32, i32
  }
  func.func @transform_3(%arg0: i32) -> (i32, i32) {
    %c0_i32 = arith.constant 0 : i32
    %c0_i32_0 = arith.constant 0 : i32
    %c0_i32_1 = arith.constant 0 : i32
    return %c0_i32, %c0_i32_0 : i32, i32
  }
  func.func @transform_4(%arg0: i32) -> (i32, i32) {
    %c0_i32 = arith.constant 0 : i32
    %c0_i32_0 = arith.constant 0 : i32
    %c0_i32_1 = arith.constant 0 : i32
    return %c0_i32, %c0_i32_0 : i32, i32
  }
  func.func @transform_5(%arg0: i32) -> (i32, i32) {
    %c0_i32 = arith.constant 0 : i32
    %c0_i32_0 = arith.constant 0 : i32
    %c0_i32_1 = arith.constant 0 : i32
    return %c0_i32, %c0_i32_0 : i32, i32
  }
  func.func @transform_6(%arg0: i32) -> (i32, i32) {
    %c0_i32 = arith.constant 0 : i32
    %c0_i32_0 = arith.constant 0 : i32
    %c0_i32_1 = arith.constant 0 : i32
    return %c0_i32, %c0_i32_0 : i32, i32
  }
  func.func @transform_7(%arg0: i32) -> (i32, i32) {
    %c0_i32 = arith.constant 0 : i32
    %c0_i32_0 = arith.constant 0 : i32
    %c0_i32_1 = arith.constant 0 : i32
    return %c0_i32, %c0_i32_0 : i32, i32
  }
}

</mosaic_0001>

<bundles_post_ra>
// kernel: gru_forward.2
= control target key start
LH: loop header
LB: loop body
LE: loop exit
PB: predicated region body
PF: predicated region fallthrough
CT: control target
= control target key end

     0   :  { %s1392_s18 = smov 0   ;;  %s1756_s0 = inlined_call_operand.vmem [shape: bf16[64,16], index: 0, kind: input, shape index: {}]   ;;  %s1757_s1 = inlined_call_operand.vmem [shape: bf16[16,384], index: 1, kind: input, shape index: {}]   ;;  %s1758_s2 = inlined_call_operand.vmem [shape: bf16[128,384], index: 2, kind: input, shape index: {}]   ;;  %s1759_s3 = inlined_call_operand.vmem [shape: f32[1,384], index: 3, kind: input, shape index: {}]   ;;  %s1760_s4 = inlined_call_operand.vmem [shape: f32[1,384], index: 4, kind: input, shape index: {}]   ;;  %s1761_s5 = inlined_call_operand.vmem [shape: bf16[64,128], index: 5, kind: output, shape index: {}]  }
   0x1 LB: > { %s1082_s19 = sadd.s32 4294967295, %s1356_s18   ;;  %p1086_p0 = scmp.ge.s32.totalorder %s1356_s18, 1  ;;  %s1356_s18 = sphi %s1392_s18, %s15_s18  }
   0x2   : > { %p188_p1 = scmp.lt.s32.totalorder %s1356_s18, 3 }
   0x4   : > { %p189_p2 = pnand %p1086_p0, %p188_p1 }
   0x5   : > { %s1087_s20 = sshll.u32 (!%p189_p2), %s1082_s19, 2  ;;  %p1091_p4 = scmp.ne.s32.totalorder (!%p189_p2), %s1082_s19, 0 }
   0x6   : > { %192 = sbr.rel (%p189_p2) target bundleno = 1110 (0x456), region = 40  ;;  %p217_p3 = scmp.lt.s32.totalorder (!%p189_p2), %s1087_s20, 7 }
   0xd   : > { %s1763_s20 = smov (!%p217_p3, %s1087_s20), 7  ;;  %232 = sbr.rel (%p1091_p4) target bundleno = 20 (0x14), region = 44 }
   0xe   : > { %s1088_s21 = sshll.u32 %s1763_s20, 2  ;;  %v1358_v0 = vmov (!%p1091_p4), 0.0  }
   0xf   : > { %s220_s24 = scalar_lea.vmem %s1756_s0, %s1088_s21  ;;  %s1406_s27 = scalar_lea.vmem %s1761_s5, %s1088_s21  ;;  %233 = vst [vmem:[#allocation2] sm:$0xff] (!%p1091_p4), %v1358_v0 }
  0x14 PF: > { %v1272_v1 = vld [vmem:[%s1757_s1 + $0x4] ss:$12 sps:$4 sm:$0xff]   ;;  %v1274_v2 = vld [vmem:[%s1757_s1] ss:$12 sps:$4 sm:$0xff]   ;;  %v1359_v3 = vmov 0   ;;  %vm268_vm0 = vcmask 130048   ;;  %v423_v34 = vlaneseq }
  0x15   : > { %307 = vmatprep.mubr.bf16.mxu0 %v1359_v3  ;;  %275 = vmatprep.subr.bf16.mxu0 %v1272_v1  ;;  %v1275_v4 = vld [vmem:[%s220_s24] sm:$0xff]   ;;  %v1428_v7 = vld [vmem:[%s1758_s2 + $0x1c] ss:$12 sps:$4 sm:$0xff]   ;;  %v1459_v13 = vld [vmem:[%s1758_s2 + $0x4c] ss:$12 sps:$4 sm:$0xff]   ;;  %v1360_v16 = vmov 0.0  }
  0x16   : > { %276 = vmatpush1.bf16.msra.mxu0 %v1274_v2  ;;  %v1418_v5 = vld [vmem:[%s1758_s2 + $0x4] ss:$12 sps:$4 sm:$0xff]   ;;  %v1423_v6 = vld [vmem:[%s1758_s2] ss:$12 sps:$4 sm:$0xff]   ;;  %1176 = vmatprep.mubr.msk.bf16.mxu1 %vm268_vm0, %v1275_v4  ;;  %v1294_v12 = vld [vmem:[%s1757_s1 + $0x8] ss:$12 sps:$4 sm:$0xff]  }
  0x17   : > { %591 = vmatprep.subr.bf16.mxu0 %v1418_v5  ;;  %v1437_v8 = vld [vmem:[%s1758_s2 + $0x18] ss:$12 sps:$4 sm:$0xff]   ;;  %v1444_v9 = vld [vmem:[%s1758_s2 + $0x34] ss:$12 sps:$4 sm:$0xff]   ;;  %v1449_v10 = vld [vmem:[%s1758_s2 + $0x30] ss:$12 sps:$4 sm:$0xff]   ;;  %1174 = vmatprep.subr.bf16.mxu1 %v1294_v12 }
  0x18   : > { %v1293_v11 = vld [vmem:[%s220_s24 + $0x8] sm:$0xff]   ;;  %1175 = vmatpush3.bf16.msra.mxu1 %v1294_v12  ;;  %v1478_v17 = vld [vmem:[%s1758_s2 + $0x64] ss:$12 sps:$4 sm:$0xff]   ;;  %vm1361_vm1 = vmmov 0   ;;  %v1520_v23 = vld [vmem:[%s1758_s2 + $0x94] ss:$12 sps:$4 sm:$0xff]  }
  0x19   : > { %1097 = vmatmul.mubr.msk.bf16.vlgmr.msra.gmra.mrb[0].mxu0 %vm268_vm0, %v1275_v4  ;;  %v1465_v14 = vld [vmem:[%s1758_s2 + $0x8] ss:$12 sps:$4 sm:$0xff]   ;;  %1180 = vmatprep.subr.bf16.mxu1 %v1360_v16  ;;  %v1486_v18 = vld [vmem:[%s1758_s2 + $0x20] ss:$12 sps:$4 sm:$0xff]   ;;  %v1507_v21 = vld [vmem:[%s1758_s2 + $0x38] ss:$12 sps:$4 sm:$0xff]  }
  0x1a   : > { %592 = vmatpush1.bf16.msra.mxu0 %v1423_v6  ;;  %317 = vmatprep.mubr.bf16.mxu0 %v1359_v3  ;;  %v1471_v15 = vld [vmem:[%s1758_s2 + $0x48] ss:$12 sps:$4 sm:$0xff]   ;;  %v1494_v19 = vld [vmem:[%s1758_s2 + $0x60] ss:$12 sps:$4 sm:$0xff]   ;;  %v1513_v22 = vld [vmem:[%s1758_s2 + $0x78] ss:$12 sps:$4 sm:$0xff]  }
  0x1b   : > { %593 = vmatprep.subr.bf16.mxu0 %v1428_v7  ;;  %1177 = vmatmul.mubr.msk.bf16.vlgmr.msra.gmra.mrb[0].mxu1 %vm268_vm0, %v1293_v11  ;;  %v1501_v20 = vld [vmem:[%s1758_s2 + $0x7c] ss:$12 sps:$4 sm:$0xff]   ;;  %v1539_v26 = vld [vmem:[%s1758_s2 + $0xac] ss:$12 sps:$4 sm:$0xff]   ;;  %v1553_v29 = vld [vmem:[#allocation2] sm:$0xff]  ;;  %v424_v35 = vshrl.u32 %v423_v34, 7 }
  0x1c   : > { %1181 = vmatpush3.bf16.msra.mxu1 %v1465_v14  ;;  %1196 = vmatprep.mubr.msk.bf16.mxu1 %vm1361_vm1, %v1360_v16  ;;  %v1526_v24 = vld [vmem:[%s1758_s2 + $0x50] ss:$12 sps:$4 sm:$0xff]   ;;  %v1545_v27 = vld [vmem:[%s1758_s2 + $0x68] ss:$12 sps:$4 sm:$0xff]   ;;  %v462_v30 = vpack.c.bf16 %v1553_v29, %v1553_v29  ;;  %v1563_v31 = vld [vmem:[%s1758_s2 + $0x80] ss:$12 sps:$4 sm:$0xff]  }
  0x1d   : > { %1182 = vmatprep.subr.bf16.mxu1 %v1360_v16  ;;  %v1532_v25 = vld [vmem:[%s1758_s2 + $0x90] ss:$12 sps:$4 sm:$0xff]   ;;  %v1551_v28 = vld [vmem:[%s1758_s2 + $0xa8] ss:$12 sps:$4 sm:$0xff]   ;;  %v1572_v32 = vld [vmem:[%s1758_s2 + $0x98] ss:$12 sps:$4 sm:$0xff]  }
  0x1e   : > { %594 = vmatpush1.bf16.msra.mxu0 %v1437_v8  ;;  %v1582_v33 = vld [vmem:[%s1758_s2 + $0xb0] ss:$12 sps:$4 sm:$0xff]   ;;  %v425_v36 = vsub.s32 0, %v424_v35  ;;  %v421_v37 = vld [vmem:[%s1759_s3] sm:$0x7]  ;;  %v429_v38 = vsub.s32 1, %v424_v35 }
  0x1f   : > { %595 = vmatprep.subr.bf16.mxu0 %v1444_v9  ;;  %v433_v47 = vsub.s32 2, %v424_v35  ;;  %v438_v0 = vld [vmem:[%s1760_s4] sm:$0x7] }
  0x20   : > { %1183 = vmatpush3.bf16.msra.mxu1 %v1486_v18  ;;  %v426_v39 = vrot.slane %v421_v37, %v425_v36  ;;  %v430_v42 = vrot.slane %v421_v37, %v429_v38  ;;  %v1643_v1 = vrot.slane %v438_v0, %v425_v36  ;;  %v1645_v2 = vrot.slane %v438_v0, %v429_v38 }
  0x21   : > { %1098 = vmatmul.mubr.msk.bf16.gmra.mrb[4].mxu0 %vm268_vm0, %v1293_v11  ;;  %1184 = vmatprep.subr.bf16.mxu1 %v1360_v16  ;;  %v434_v49 = vrot.slane %v421_v37, %v433_v47 }
  0x22   : > { %596 = vmatpush1.bf16.msra.mxu0 %v1449_v10  ;;  %623 = vmatprep.mubr.bf16.mxu0 %v1359_v3 }
  0x23   : > { %597 = vmatprep.subr.bf16.mxu0 %v1459_v13 }
  0x24   : > { %1185 = vmatpush3.bf16.msra.mxu1 %v1507_v21 }
  0x25   : > { %1186 = vmatprep.subr.bf16.mxu1 %v1360_v16 }
  0x26   : > { %598 = vmatpush1.bf16.msra.mxu0 %v1471_v15 }
  0x27   : > { %599 = vmatprep.subr.bf16.mxu0 %v1478_v17 }
  0x28   : > { %1187 = vmatpush3.bf16.msra.mxu1 %v1526_v24 }
  0x29   : > { %1188 = vmatprep.subr.bf16.mxu1 %v1360_v16 }
  0x2a   : > { %600 = vmatpush1.bf16.msra.mxu0 %v1494_v19 }
  0x2b   : > { %601 = vmatprep.subr.bf16.mxu0 %v1501_v20 }
  0x2c   : > { %1189 = vmatpush3.bf16.msra.mxu1 %v1545_v27 }
  0x2d   : > { %1190 = vmatprep.subr.bf16.mxu1 %v1360_v16 }
  0x2e   : > { %602 = vmatpush1.bf16.msra.mxu0 %v1513_v22 }
  0x2f   : > { %603 = vmatprep.subr.bf16.mxu0 %v1520_v23 }
  0x30   : > { %1191 = vmatpush3.bf16.msra.mxu1 %v1563_v31 }
  0x31   : > { %1192 = vmatprep.subr.bf16.mxu1 %v1360_v16 }
  0x32   : > { %604 = vmatpush1.bf16.msra.mxu0 %v1532_v25 }
  0x33   : > { %605 = vmatprep.subr.bf16.mxu0 %v1539_v26 }
  0x34   : > { %1193 = vmatpush3.bf16.msra.mxu1 %v1572_v32 }
  0x35   : > { %1194 = vmatprep.subr.bf16.mxu1 %v1360_v16 }
  0x36   : > { %606 = vmatpush1.bf16.msra.mxu0 %v1551_v28 }
  0x37   : > { %701 = vmatprep.subr.bf16.mxu0 %v1418_v5 }
  0x38   : > { %1195 = vmatpush3.bf16.msra.mxu1 %v1582_v33 }
  0x39   : > { %624 = vmatmul.mubr.bf16.vlgmr.msra.gmra.mrb[8].mxu0 %v462_v30  ;;  %1200 = vmatprep.subr.bf16.mxu1 %v1360_v16 }
  0x3a   : > { %702 = vmatpush1.bf16.msra.mxu0 %v1423_v6  ;;  %733 = vmatprep.mubr.bf16.mxu0 %v1359_v3 }
  0x3b   : > { %703 = vmatprep.subr.bf16.mxu0 %v1428_v7  ;;  %1197 = vmatmul.mubr.bf16.vlgmr.msra.gmra.mrb[4].mxu1 %v462_v30 }
  0x3c   : > { %1201 = vmatpush3.bf16.msra.mxu1 %v1465_v14  ;;  %1216 = vmatprep.mubr.msk.bf16.mxu1 %vm1361_vm1, %v1360_v16 }
  0x3d   : > { %1202 = vmatprep.subr.bf16.mxu1 %v1360_v16 }
  0x3e   : > { %704 = vmatpush1.bf16.msra.mxu0 %v1437_v8 }
  0x3f   : > { %705 = vmatprep.subr.bf16.mxu0 %v1444_v9 }
  0x40   : > { %1203 = vmatpush3.bf16.msra.mxu1 %v1486_v18 }
  0x41   : > { %1204 = vmatprep.subr.bf16.mxu1 %v1360_v16 }
  0x42   : > { %706 = vmatpush1.bf16.msra.mxu0 %v1449_v10 }
  0x43   : > { %707 = vmatprep.subr.bf16.mxu0 %v1459_v13 }
  0x44   : > { %1205 = vmatpush3.bf16.msra.mxu1 %v1507_v21 }
  0x45   : > { %1206 = vmatprep.subr.bf16.mxu1 %v1360_v16 }
  0x46   : > { %708 = vmatpush1.bf16.msra.mxu0 %v1471_v15 }
  0x47   : > { %709 = vmatprep.subr.bf16.mxu0 %v1478_v17 }
  0x48   : > { %1207 = vmatpush3.bf16.msra.mxu1 %v1526_v24 }
  0x49   : > { %1208 = vmatprep.subr.bf16.mxu1 %v1360_v16 }
  0x4a   : > { %710 = vmatpush1.bf16.msra.mxu0 %v1494_v19 }
  0x4b   : > { %711 = vmatprep.subr.bf16.mxu0 %v1501_v20 }
  0x4c   : > { %1209 = vmatpush3.bf16.msra.mxu1 %v1545_v27 }
  0x4d   : > { %1210 = vmatprep.subr.bf16.mxu1 %v1360_v16 }
  0x4e   : > { %712 = vmatpush1.bf16.msra.mxu0 %v1513_v22 }
  0x4f   : > { %713 = vmatprep.subr.bf16.mxu0 %v1520_v23 }
  0x50   : > { %1211 = vmatpush3.bf16.msra.mxu1 %v1563_v31 }
  0x51   : > { %1212 = vmatprep.subr.bf16.mxu1 %v1360_v16 }
  0x52   : > { %714 = vmatpush1.bf16.msra.mxu0 %v1532_v25 }
  0x53   : > { %715 = vmatprep.subr.bf16.mxu0 %v1539_v26 }
  0x54   : > { %1213 = vmatpush3.bf16.msra.mxu1 %v1572_v32 }
  0x55   : > { %1214 = vmatprep.subr.bf16.mxu1 %v1360_v16 }
  0x56   : > { %716 = vmatpush1.bf16.msra.mxu0 %v1551_v28 }
  0x57   : > { %811 = vmatprep.subr.bf16.mxu0 %v1418_v5 }
  0x58   : > { %1215 = vmatpush3.bf16.msra.mxu1 %v1582_v33 }
  0x59   : > { %1220 = vmatprep.subr.bf16.mxu1 %v1360_v16 }
  0xec   : > { %v309_v40 = vpop.f32.mrb[0].mxu0 }
  0xed   : > { %v311_v41 = vpop.f32.mrb[1].mxu0  ;;  %v459_v11 = vadd.f32 %v426_v39, %v309_v40  ;;  %v1649_v40 = vrot.slane %v438_v0, %v433_v47 }
  0xee   : > { %v313_v43 = vpop.f32.mrb[2].mxu0  ;;  %v1178_v56 = vpop.f32.mrb[0].mxu1  ;;  %v460_v34 = vadd.f32 %v430_v42, %v311_v41 }
  0xef   : > { %v1622_v44 = vadd.f32 %v426_v39, %v313_v43  ;;  %v315_v45 = vpop.f32.mrb[3].mxu0  ;;  %v1634_v58 = vadd.f32 %v1178_v56, %v434_v49  ;;  %v362_v59 = vpop.f32.mrb[1].mxu1 }
  0xf0   : > { %v1624_v46 = vadd.f32 %v430_v42, %v315_v45  ;;  %v1179_v60 = vpop.f32.mrb[2].mxu1 }
  0xf1   : > { %v1636_v61 = vadd.f32 %v1179_v60, %v434_v49  ;;  %v365_v62 = vpop.f32.mrb[3].mxu1 }
  0xf2   : > { %v1638_v63 = vadd.f32 %v434_v49, %v365_v62 }
  0xf4   : > { %v319_v48 = vpop.f32.mrb[4].mxu0 }
  0xf5   : > { %v1626_v50 = vadd.f32 %v426_v39, %v319_v48  ;;  %v321_v51 = vpop.f32.mrb[5].mxu0 }
  0xf6   : > { %v1628_v52 = vadd.f32 %v430_v42, %v321_v51  ;;  %v323_v53 = vpop.f32.mrb[6].mxu0 }
  0xf7   : > { %v1630_v54 = vadd.f32 %v426_v39, %v323_v53  ;;  %v325_v55 = vpop.f32.mrb[7].mxu0 }
  0xf8   : > { %v1632_v57 = vadd.f32 %v430_v42, %v325_v55 }
 0x10c   : > { %v625_v4 = vpop.f32.mrb[8].mxu0 }
 0x10d   : > { %v626_v12 = vadd.f32 %v625_v4, %v1643_v1  ;;  %v627_v30 = vpop.f32.mrb[9].mxu0 }
 0x10e   : > { %v628_v35 = vadd.f32 %v627_v30, %v1645_v2  ;;  %v629_v37 = vpop.f32.mrb[10].mxu0  ;;  %v666_v55 = vpop.f32.mrb[4].mxu1 }
 0x10f   : > { %v672_v43 = vadd.f32 %v626_v12, %v459_v11  ;;  %v630_v45 = vpop.f32.mrb[11].mxu0  ;;  %v1198_v36 = vpop.f32.mrb[5].mxu1  ;;  %v667_v62 = vadd.f32 %v666_v55, %v1649_v40  ;;  %v461_v11 = vadd.f32 %v434_v49, %v362_v59 }
 0x110   : > { %v679_v48 = vadd.f32 %v628_v35, %v460_v34  ;;  %v669_v56 = vpop.f32.mrb[6].mxu1 }
 0x111   : > { %v1125_v51 = vmul.f32 -1.442695, %v672_v43  ;;  %v1199_v38 = vpop.f32.mrb[7].mxu1 }
 0x112   : > { %v1126_v53 = vmul.f32 -1.442695, %v679_v48 }
 0x113   : > { %1310 = vpow2.f32 %v1125_v51 }
 0x114   : > { %1312 = vpow2.f32 %v1126_v53 }
 0x11d   : > { %v1311_v60 = vpop.eup %1310 }
 0x11e   : > { %v676_v39 = vadd.f32 1.0, %v1311_v60  ;;  %v1313_v41 = vpop.eup %1312 }
 0x11f   : > { %v683_v42 = vadd.f32 1.0, %v1313_v41 }
 0x120   : > { %1314 = vrcp.f32 %v676_v39 }
 0x121   : > { %1316 = vrcp.f32 %v683_v42 }
 0x12a   : > { %v1315_v4 = vpop.eup %1314 }
 0x12b   : > { %v686_v12 = vmul.f32 %v1315_v4, %v667_v62  ;;  %v1317_v34 = vpop.eup %1316 }
 0x12c   : > { %v689_v35 = vsub.f32 1.0, %v1317_v34  ;;  %v691_v45 = vmul.f32 %v1317_v34, %v1553_v29 }
 0x12d   : > { %v687_v30 = vadd.f32 %v686_v12, %v461_v11 }
 0x12f   : > { %1318 = vtanh.f32 %v687_v30 }
 0x139   : > { %v1319_v37 = vpop.eup %1318 }
 0x13a   : > { %v690_v43 = vmul.f32 %v1319_v37, %v689_v35 }
 0x13c   : > { %v1653_v48 = vadd.f32 %v691_v45, %v690_v43 }
 0x13e   : > { %v693_v47 = vpack.c.bf16 %v1653_v48, %v1653_v48 }
 0x140   : > { %694 = vst [vmem:[%s1406_s27] sm:$0xf] %v693_v47  ;;  %734 = vmatmul.mubr.bf16.vlgmr.msra.gmra.mrb[12].mxu0 %v693_v47  ;;  %1217 = vmatmul.mubr.bf16.vlgmr.msra.gmra.mrb[8].mxu1 %v693_v47 }
 0x141   : > { %812 = vmatpush1.bf16.msra.mxu0 %v1423_v6  ;;  %1221 = vmatpush3.bf16.msra.mxu1 %v1465_v14 }
 0x142   : > { %813 = vmatprep.subr.bf16.mxu0 %v1428_v7  ;;  %1222 = vmatprep.subr.bf16.mxu1 %v1360_v16 }
 0x143   : > { %843 = vmatprep.mubr.bf16.mxu0 %v1359_v3  ;;  %1236 = vmatprep.mubr.msk.bf16.mxu1 %vm1361_vm1, %v1360_v16 }
 0x145   : > { %814 = vmatpush1.bf16.msra.mxu0 %v1437_v8  ;;  %1223 = vmatpush3.bf16.msra.mxu1 %v1486_v18 }
 0x146   : > { %815 = vmatprep.subr.bf16.mxu0 %v1444_v9  ;;  %1224 = vmatprep.subr.bf16.mxu1 %v1360_v16 }
 0x149   : > { %816 = vmatpush1.bf16.msra.mxu0 %v1449_v10  ;;  %1225 = vmatpush3.bf16.msra.mxu1 %v1507_v21 }
 0x14a   : > { %817 = vmatprep.subr.bf16.mxu0 %v1459_v13  ;;  %1226 = vmatprep.subr.bf16.mxu1 %v1360_v16 }
 0x14d   : > { %818 = vmatpush1.bf16.msra.mxu0 %v1471_v15  ;;  %1227 = vmatpush3.bf16.msra.mxu1 %v1526_v24 }
 0x14e   : > { %819 = vmatprep.subr.bf16.mxu0 %v1478_v17  ;;  %1228 = vmatprep.subr.bf16.mxu1 %v1360_v16 }
 0x151   : > { %820 = vmatpush1.bf16.msra.mxu0 %v1494_v19  ;;  %1229 = vmatpush3.bf16.msra.mxu1 %v1545_v27 }
 0x152   : > { %821 = vmatprep.subr.bf16.mxu0 %v1501_v20  ;;  %1230 = vmatprep.subr.bf16.mxu1 %v1360_v16 }
 0x155   : > { %822 = vmatpush1.bf16.msra.mxu0 %v1513_v22  ;;  %1231 = vmatpush3.bf16.msra.mxu1 %v1563_v31 }
 0x156   : > { %823 = vmatprep.subr.bf16.mxu0 %v1520_v23  ;;  %1232 = vmatprep.subr.bf16.mxu1 %v1360_v16 }
 0x159   : > { %824 = vmatpush1.bf16.msra.mxu0 %v1532_v25  ;;  %1233 = vmatpush3.bf16.msra.mxu1 %v1572_v32 }
 0x15a   : > { %825 = vmatprep.subr.bf16.mxu0 %v1539_v26  ;;  %1234 = vmatprep.subr.bf16.mxu1 %v1360_v16 }
 0x15d   : > { %826 = vmatpush1.bf16.msra.mxu0 %v1551_v28  ;;  %1235 = vmatpush3.bf16.msra.mxu1 %v1582_v33 }
 0x15e   : > { %921 = vmatprep.subr.bf16.mxu0 %v1418_v5  ;;  %1240 = vmatprep.subr.bf16.mxu1 %v1360_v16 }
 0x213   : > { %v735_v29 = vpop.f32.mrb[12].mxu0  ;;  %v776_v49 = vpop.f32.mrb[8].mxu1 }
 0x214   : > { %v736_v59 = vadd.f32 %v735_v29, %v1643_v1  ;;  %v737_v0 = vpop.f32.mrb[13].mxu0  ;;  %v1218_v51 = vpop.f32.mrb[9].mxu1  ;;  %v777_v12 = vadd.f32 %v776_v49, %v1649_v40 }
 0x215   : > { %v738_v53 = vadd.f32 %v737_v0, %v1645_v2  ;;  %v739_v55 = vpop.f32.mrb[14].mxu0  ;;  %v779_v36 = vpop.f32.mrb[10].mxu1 }
 0x216   : > { %v782_v56 = vadd.f32 %v736_v59, %v1622_v44  ;;  %v740_v38 = vpop.f32.mrb[15].mxu0  ;;  %v1219_v60 = vpop.f32.mrb[11].mxu1 }
 0x217   : > { %v789_v39 = vadd.f32 %v738_v53, %v1624_v46 }
 0x218   : > { %v1127_v41 = vmul.f32 -1.442695, %v782_v56 }
 0x219   : > { %v1128_v5 = vmul.f32 -1.442695, %v789_v39 }
 0x21a   : > { %1320 = vpow2.f32 %v1127_v41 }
 0x21b   : > { %1322 = vpow2.f32 %v1128_v5 }
 0x224   : > { %v1321_v42 = vpop.eup %1320 }
 0x225   : > { %v786_v62 = vadd.f32 1.0, %v1321_v42  ;;  %v1323_v4 = vpop.eup %1322 }
 0x226   : > { %v793_v11 = vadd.f32 1.0, %v1323_v4 }
 0x227   : > { %1324 = vrcp.f32 %v786_v62 }
 0x228   : > { %1326 = vrcp.f32 %v793_v11 }
 0x231   : > { %v1325_v30 = vpop.eup %1324 }
 0x232   : > { %v796_v34 = vmul.f32 %v1325_v30, %v777_v12  ;;  %v1327_v35 = vpop.eup %1326 }
 0x233   : > { %v799_v46 = vsub.f32 1.0, %v1327_v35  ;;  %v801_v45 = vmul.f32 %v1327_v35, %v1653_v48 }
 0x234   : > { %v797_v44 = vadd.f32 %v796_v34, %v1638_v63 }
 0x236   : > { %1328 = vtanh.f32 %v797_v44 }
 0x240   : > { %v1329_v37 = vpop.eup %1328 }
 0x241   : > { %v800_v43 = vmul.f32 %v1329_v37, %v799_v46 }
 0x243   : > { %v1700_v47 = vadd.f32 %v801_v45, %v800_v43 }
 0x245   : > { %v803_v29 = vpack.c.bf16 %v1700_v47, %v1700_v47 }
 0x247   : > { %804 = vst [vmem:[%s1406_s27 + $0x4] sm:$0xf] %v803_v29  ;;  %844 = vmatmul.mubr.bf16.vlgmr.msra.gmra.mrb[16].mxu0 %v803_v29  ;;  %1237 = vmatmul.mubr.bf16.vlgmr.msra.gmra.mrb[12].mxu1 %v803_v29 }
 0x248   : > { %922 = vmatpush1.bf16.msra.mxu0 %v1423_v6  ;;  %1241 = vmatpush3.bf16.msra.mxu1 %v1465_v14 }
 0x249   : > { %923 = vmatprep.subr.bf16.mxu0 %v1428_v7  ;;  %1242 = vmatprep.subr.bf16.mxu1 %v1360_v16 }
 0x24a   : > { %953 = vmatprep.mubr.bf16.mxu0 %v1359_v3  ;;  %1256 = vmatprep.mubr.msk.bf16.mxu1 %vm1361_vm1, %v1360_v16 }
 0x24c   : > { %924 = vmatpush1.bf16.msra.mxu0 %v1437_v8  ;;  %1243 = vmatpush3.bf16.msra.mxu1 %v1486_v18 }
 0x24d   : > { %925 = vmatprep.subr.bf16.mxu0 %v1444_v9  ;;  %1244 = vmatprep.subr.bf16.mxu1 %v1360_v16 }
 0x250   : > { %926 = vmatpush1.bf16.msra.mxu0 %v1449_v10  ;;  %1245 = vmatpush3.bf16.msra.mxu1 %v1507_v21 }
 0x251   : > { %927 = vmatprep.subr.bf16.mxu0 %v1459_v13  ;;  %1246 = vmatprep.subr.bf16.mxu1 %v1360_v16 }
 0x254   : > { %928 = vmatpush1.bf16.msra.mxu0 %v1471_v15  ;;  %1247 = vmatpush3.bf16.msra.mxu1 %v1526_v24 }
 0x255   : > { %929 = vmatprep.subr.bf16.mxu0 %v1478_v17  ;;  %1248 = vmatprep.subr.bf16.mxu1 %v1360_v16 }
 0x258   : > { %930 = vmatpush1.bf16.msra.mxu0 %v1494_v19  ;;  %1249 = vmatpush3.bf16.msra.mxu1 %v1545_v27 }
 0x259   : > { %931 = vmatprep.subr.bf16.mxu0 %v1501_v20  ;;  %1250 = vmatprep.subr.bf16.mxu1 %v1360_v16 }
 0x25c   : > { %932 = vmatpush1.bf16.msra.mxu0 %v1513_v22  ;;  %1251 = vmatpush3.bf16.msra.mxu1 %v1563_v31 }
 0x25d   : > { %933 = vmatprep.subr.bf16.mxu0 %v1520_v23  ;;  %1252 = vmatprep.subr.bf16.mxu1 %v1360_v16 }
 0x260   : > { %934 = vmatpush1.bf16.msra.mxu0 %v1532_v25  ;;  %1253 = vmatpush3.bf16.msra.mxu1 %v1572_v32 }
 0x261   : > { %935 = vmatprep.subr.bf16.mxu0 %v1539_v26  ;;  %1254 = vmatprep.subr.bf16.mxu1 %v1360_v16 }
 0x264   : > { %936 = vmatpush1.bf16.msra.mxu0 %v1551_v28  ;;  %1255 = vmatpush3.bf16.msra.mxu1 %v1582_v33 }
 0x31a   : > { %v845_v3 = vpop.f32.mrb[16].mxu0  ;;  %v886_v6 = vpop.f32.mrb[12].mxu1 }
 0x31b   : > { %v846_v7 = vadd.f32 %v845_v3, %v1643_v1  ;;  %v847_v8 = vpop.f32.mrb[17].mxu0  ;;  %v1238_v9 = vpop.f32.mrb[13].mxu1  ;;  %v887_v25 = vadd.f32 %v886_v6, %v1649_v40 }
 0x31c   : > { %v848_v10 = vadd.f32 %v847_v8, %v1645_v2  ;;  %v849_v13 = vpop.f32.mrb[18].mxu0  ;;  %v889_v14 = vpop.f32.mrb[14].mxu1 }
 0x31d   : > { %v892_v15 = vadd.f32 %v846_v7, %v1626_v50  ;;  %v850_v17 = vpop.f32.mrb[19].mxu0  ;;  %v1239_v18 = vpop.f32.mrb[15].mxu1 }
 0x31e   : > { %v899_v16 = vadd.f32 %v848_v10, %v1628_v52 }
 0x31f   : > { %v1129_v19 = vmul.f32 -1.442695, %v892_v15 }
 0x320   : > { %v1130_v20 = vmul.f32 -1.442695, %v899_v16 }
 0x321   : > { %1330 = vpow2.f32 %v1129_v19 }
 0x322   : > { %1332 = vpow2.f32 %v1130_v20 }
 0x32b   : > { %v1331_v21 = vpop.eup %1330 }
 0x32c   : > { %v896_v22 = vadd.f32 1.0, %v1331_v21  ;;  %v1333_v23 = vpop.eup %1332 }
 0x32d   : > { %v903_v24 = vadd.f32 1.0, %v1333_v23 }
 0x32e   : > { %1334 = vrcp.f32 %v896_v22 }
 0x32f   : > { %1336 = vrcp.f32 %v903_v24 }
 0x338   : > { %v1335_v26 = vpop.eup %1334 }
 0x339   : > { %v906_v27 = vmul.f32 %v1335_v26, %v887_v25  ;;  %v1337_v31 = vpop.eup %1336 }
 0x33a   : > { %v909_v32 = vsub.f32 1.0, %v1337_v31  ;;  %v911_v52 = vmul.f32 %v1337_v31, %v1700_v47 }
 0x33b   : > { %v907_v28 = vadd.f32 %v906_v27, %v1634_v58 }
 0x33d   : > { %1338 = vtanh.f32 %v907_v28 }
 0x347   : > { %v1339_v33 = vpop.eup %1338 }
 0x348   : > { %v910_v50 = vmul.f32 %v1339_v33, %v909_v32 }
 0x34a   : > { %v912_v63 = vadd.f32 %v911_v52, %v910_v50 }
 0x34c   : > { %v913_v48 = vpack.c.bf16 %v912_v63, %v912_v63 }
 0x34e   : > { %914 = vst [vmem:[%s1406_s27 + $0x8] sm:$0xf] %v913_v48  ;;  %954 = vmatmul.mubr.bf16.vlgmr.msra.gmra.mrb[20].mxu0 %v913_v48  ;;  %1257 = vmatmul.mubr.bf16.vlgmr.msra.gmra.mrb[16].mxu1 %v913_v48 }
 0x421   : > { %v955_v49 = vpop.f32.mrb[20].mxu0  ;;  %v996_v59 = vpop.f32.mrb[16].mxu1 }
 0x422   : > { %v956_v0 = vadd.f32 %v955_v49, %v1643_v1  ;;  %v957_v51 = vpop.f32.mrb[21].mxu0  ;;  %v1258_v53 = vpop.f32.mrb[17].mxu1 }
 0x423   : > { %v958_v58 = vadd.f32 %v957_v51, %v1645_v2  ;;  %v959_v55 = vpop.f32.mrb[22].mxu0  ;;  %v999_v36 = vpop.f32.mrb[18].mxu1  ;;  %v997_v2 = vadd.f32 %v996_v59, %v1649_v40 }
 0x424   : > { %v1002_v56 = vadd.f32 %v956_v0, %v1630_v54  ;;  %v960_v38 = vpop.f32.mrb[23].mxu0  ;;  %v1259_v60 = vpop.f32.mrb[19].mxu1 }
 0x425   : > { %v1009_v39 = vadd.f32 %v958_v58, %v1632_v57 }
 0x426   : > { %v1131_v41 = vmul.f32 -1.442695, %v1002_v56 }
 0x427   : > { %v1132_v5 = vmul.f32 -1.442695, %v1009_v39 }
 0x428   : > { %1340 = vpow2.f32 %v1131_v41 }
 0x429   : > { %1342 = vpow2.f32 %v1132_v5 }
 0x432   : > { %v1341_v42 = vpop.eup %1340 }
 0x433   : > { %v1006_v62 = vadd.f32 1.0, %v1341_v42  ;;  %v1343_v1 = vpop.eup %1342 }
 0x434   : > { %v1013_v4 = vadd.f32 1.0, %v1343_v1 }
 0x435   : > { %1344 = vrcp.f32 %v1006_v62 }
 0x436   : > { %1346 = vrcp.f32 %v1013_v4 }
 0x43f   : > { %v1345_v11 = vpop.eup %1344 }
 0x440   : > { %v1016_v12 = vmul.f32 %v1345_v11, %v997_v2  ;;  %v1347_v30 = vpop.eup %1346 }
 0x441   : > { %v1019_v57 = vsub.f32 1.0, %v1347_v30  ;;  %v1021_v35 = vmul.f32 %v1347_v30, %v912_v63 }
 0x442   : > { %v1017_v54 = vadd.f32 %v1016_v12, %v1636_v61 }
 0x444   : > { %1348 = vtanh.f32 %v1017_v54 }
 0x44e   : > { %v1349_v34 = vpop.eup %1348 }
 0x44f   : > { %v1020_v44 = vmul.f32 %v1349_v34, %v1019_v57 }
 0x451   : > { %v1022_v46 = vadd.f32 %v1021_v35, %v1020_v44 }
 0x453   : > { %v1023_v37 = vpack.c.bf16 %v1022_v46, %v1022_v46  ;;  %1025 = vst [vmem:[#allocation2] sm:$0xff] %v1022_v46 }
 0x455   : > { %1024 = vst [vmem:[%s1406_s27 + $0xc] sm:$0xf] %v1023_v37 }
 0x456 PF: > { %s15_s18 = sadd.s32 1, %s1356_s18  }
 0x457   : > { %p12_p5 = scmp.ge.s32.totalorder %s15_s18, 4  }
 0x459   :  { %14 = sbr.rel (!%p12_p5) target bundleno = 1 (0x1), region = 74 }

// kernel: gru_forward.3
= control target key start
LH: loop header
LB: loop body
LE: loop exit
PB: predicated region body
PF: predicated region fallthrough
CT: control target
= control target key end

     0   :  { %s1774_s24 = smov 0   ;;  %s2227_s0 = inlined_call_operand.vmem [shape: bf16[64,128], index: 0, kind: input, shape index: {}]   ;;  %s2228_s1 = inlined_call_operand.vmem [shape: bf16[128,384], index: 1, kind: input, shape index: {}]   ;;  %s2229_s2 = inlined_call_operand.vmem [shape: bf16[128,384], index: 2, kind: input, shape index: {}]   ;;  %s2230_s3 = inlined_call_operand.vmem [shape: f32[1,384], index: 3, kind: input, shape index: {}]   ;;  %s2231_s4 = inlined_call_operand.vmem [shape: f32[1,384], index: 4, kind: input, shape index: {}]   ;;  %s2232_s5 = inlined_call_operand.vmem [shape: bf16[128,128], index: 5, kind: input, shape index: {}]   ;;  %s2233_s6 = inlined_call_operand.vmem [shape: f32[1,128], index: 6, kind: input, shape index: {}]   ;;  %s2234_s7 = inlined_call_operand.vmem [shape: f32[8,128], index: 7, kind: output, shape index: {}]  }
   0x1 LB: > { %s1780_s25 = sadd.s32 4294967295, %s1726_s24   ;;  %p1343_p0 = scmp.ge.s32.totalorder %s1726_s24, 1  ;;  %s1726_s24 = sphi %s1774_s24, %s17_s24  }
   0x2   : > { %p233_p1 = scmp.lt.s32.totalorder %s1726_s24, 3 }
   0x4   : > { %p234_p2 = pnand %p1343_p0, %p233_p1 }
   0x5   : > { %s1344_s26 = sshll.u32 (!%p234_p2), %s1780_s25, 2  ;;  %p1346_p4 = scmp.ne.s32.totalorder (!%p234_p2), %s1780_s25, 0 }
   0x6   : > { %237 = sbr.rel (%p234_p2) target bundleno = 1361 (0x551), region = 48  ;;  %p261_p3 = scmp.lt.s32.totalorder (!%p234_p2), %s1344_s26, 7 }
   0xd   : > { %s2236_s26 = smov (!%p261_p3, %s1344_s26), 7  ;;  %270 = sbr.rel (%p1346_p4) target bundleno = 20 (0x14), region = 52 }
   0xe   : > { %s1345_s27 = sshll.u32 %s2236_s26, 2  ;;  %v1728_v0 = vmov (!%p1346_p4), 0.0  }
   0xf   : > { %s1788_s30 = scalar_lea.vmem %s2227_s0, %s1345_s27  ;;  %271 = vst [vmem:[#allocation2] sm:$0xff] (!%p1346_p4), %v1728_v0 }
  0x14 PF: > { %v1606_v1 = vld [vmem:[%s2228_s1 + $0x4] ss:$12 sps:$4 sm:$0xff]   ;;  %v1608_v2 = vld [vmem:[%s2228_s1] ss:$12 sps:$4 sm:$0xff]   ;;  %v1729_v3 = vmov 0   ;;  %v1730_v36 = vmov 0.0   ;;  %v596_v55 = vlaneseq }
  0x15   : > { %480 = vmatprep.mubr.bf16.mxu0 %v1729_v3  ;;  %448 = vmatprep.subr.bf16.mxu0 %v1606_v1  ;;  %v1609_v4 = vld [vmem:[%s2228_s1 + $0x1c] ss:$12 sps:$4 sm:$0xff]   ;;  %v1611_v5 = vld [vmem:[%s2228_s1 + $0x18] ss:$12 sps:$4 sm:$0xff]   ;;  %v1612_v6 = vld [vmem:[%s2228_s1 + $0x34] ss:$12 sps:$4 sm:$0xff]  }
  0x16   : > { %449 = vmatpush1.bf16.msra.mxu0 %v1608_v2  ;;  %v1614_v7 = vld [vmem:[%s2228_s1 + $0x30] ss:$12 sps:$4 sm:$0xff]   ;;  %v1615_v8 = vld [vmem:[%s2228_s1 + $0x4c] ss:$12 sps:$4 sm:$0xff]   ;;  %v1627_v9 = vld [vmem:[%s2228_s1 + $0x8] ss:$12 sps:$4 sm:$0xff]  }
  0x17   : > { %450 = vmatprep.subr.bf16.mxu0 %v1609_v4  ;;  %v1617_v10 = vld [vmem:[%s2228_s1 + $0x48] ss:$12 sps:$4 sm:$0xff]   ;;  %v1618_v11 = vld [vmem:[%s2228_s1 + $0x64] ss:$12 sps:$4 sm:$0xff]   ;;  %1472 = vmatprep.subr.bf16.mxu1 %v1627_v9  ;;  %v1631_v12 = vld [vmem:[%s2228_s1 + $0x20] ss:$12 sps:$4 sm:$0xff]  }
  0x18   : > { %1473 = vmatpush3.bf16.msra.mxu1 %v1627_v9  ;;  %v1632_v13 = vld [vmem:[%s1788_s30] sm:$0xff]   ;;  %v1621_v16 = vld [vmem:[%s2228_s1 + $0x7c] ss:$12 sps:$4 sm:$0xff]   ;;  %v1628_v22 = vld [vmem:[%s2228_s1 + $0xac] ss:$12 sps:$4 sm:$0xff]   ;;  %vm1731_vm0 = vmmov 0  }
  0x19   : > { %1474 = vmatprep.subr.bf16.mxu1 %v1631_v12  ;;  %v1620_v14 = vld [vmem:[%s2228_s1 + $0x60] ss:$12 sps:$4 sm:$0xff]   ;;  %v1635_v15 = vld [vmem:[%s2228_s1 + $0x38] ss:$12 sps:$4 sm:$0xff]   ;;  %1488 = vmatprep.mubr.bf16.mxu1 %v1632_v13  ;;  %v1639_v17 = vld [vmem:[%s2228_s1 + $0x50] ss:$12 sps:$4 sm:$0xff]  }
  0x1a   : > { %451 = vmatpush1.bf16.msra.mxu0 %v1611_v5  ;;  %v1623_v18 = vld [vmem:[%s2228_s1 + $0x78] ss:$12 sps:$4 sm:$0xff]   ;;  %v1624_v19 = vld [vmem:[%s2228_s1 + $0x94] ss:$12 sps:$4 sm:$0xff]   ;;  %v1626_v21 = vld [vmem:[%s2228_s1 + $0x90] ss:$12 sps:$4 sm:$0xff]  }
  0x1b   : > { %452 = vmatprep.subr.bf16.mxu0 %v1612_v6  ;;  %v1643_v20 = vld [vmem:[%s2228_s1 + $0x68] ss:$12 sps:$4 sm:$0xff]   ;;  %v1647_v23 = vld [vmem:[%s2228_s1 + $0x80] ss:$12 sps:$4 sm:$0xff]   ;;  %v1862_v25 = vld [vmem:[%s2229_s2 + $0x4] ss:$12 sps:$4 sm:$0xff]  }
  0x1c   : > { %1475 = vmatpush3.bf16.msra.mxu1 %v1631_v12  ;;  %v1630_v24 = vld [vmem:[%s2228_s1 + $0xa8] ss:$12 sps:$4 sm:$0xff]   ;;  %v1651_v26 = vld [vmem:[%s2228_s1 + $0x98] ss:$12 sps:$4 sm:$0xff]   ;;  %v1870_v27 = vld [vmem:[%s2229_s2] ss:$12 sps:$4 sm:$0xff]  }
  0x1d   : > { %1476 = vmatprep.subr.bf16.mxu1 %v1635_v15  ;;  %v1876_v28 = vld [vmem:[%s2229_s2 + $0x1c] ss:$12 sps:$4 sm:$0xff]   ;;  %v1885_v30 = vld [vmem:[%s2229_s2 + $0x18] ss:$12 sps:$4 sm:$0xff]   ;;  %v1892_v31 = vld [vmem:[%s2229_s2 + $0x34] ss:$12 sps:$4 sm:$0xff]  }
  0x1e   : > { %453 = vmatpush1.bf16.msra.mxu0 %v1614_v7  ;;  %v1656_v29 = vld [vmem:[%s2228_s1 + $0xb0] ss:$12 sps:$4 sm:$0xff]   ;;  %v1655_v32 = vld [vmem:[%s1788_s30 + $0x8] sm:$0xff]   ;;  %v1951_v42 = vld [vmem:[%s2229_s2 + $0x38] ss:$12 sps:$4 sm:$0xff]   ;;  %v597_v56 = vshrl.u32 %v596_v55, 7 }
  0x1f   : > { %454 = vmatprep.subr.bf16.mxu0 %v1615_v8  ;;  %v1899_v33 = vld [vmem:[%s2229_s2 + $0x30] ss:$12 sps:$4 sm:$0xff]   ;;  %v1905_v34 = vld [vmem:[%s2229_s2 + $0x4c] ss:$12 sps:$4 sm:$0xff]   ;;  %v1910_v35 = vld [vmem:[%s2229_s2 + $0x8] ss:$12 sps:$4 sm:$0xff]  }
  0x20   : > { %1477 = vmatpush3.bf16.msra.mxu1 %v1635_v15  ;;  %v1917_v37 = vld [vmem:[%s2229_s2 + $0x48] ss:$12 sps:$4 sm:$0xff]   ;;  %v1924_v38 = vld [vmem:[%s2229_s2 + $0x64] ss:$12 sps:$4 sm:$0xff]   ;;  %v1930_v39 = vld [vmem:[%s2229_s2 + $0x20] ss:$12 sps:$4 sm:$0xff]  }
  0x21   : > { %1478 = vmatprep.subr.bf16.mxu1 %v1639_v17  ;;  %v1939_v40 = vld [vmem:[%s2229_s2 + $0x60] ss:$12 sps:$4 sm:$0xff]   ;;  %v1945_v41 = vld [vmem:[%s2229_s2 + $0x7c] ss:$12 sps:$4 sm:$0xff]   ;;  %v1958_v43 = vld [vmem:[%s2229_s2 + $0x78] ss:$12 sps:$4 sm:$0xff]  }
  0x22   : > { %455 = vmatpush1.bf16.msra.mxu0 %v1617_v10  ;;  %v1964_v44 = vld [vmem:[%s2229_s2 + $0x94] ss:$12 sps:$4 sm:$0xff]   ;;  %v1970_v45 = vld [vmem:[%s2229_s2 + $0x50] ss:$12 sps:$4 sm:$0xff]   ;;  %v1983_v47 = vld [vmem:[%s2229_s2 + $0xac] ss:$12 sps:$4 sm:$0xff]  }
  0x23   : > { %456 = vmatprep.subr.bf16.mxu0 %v1618_v11  ;;  %v1977_v46 = vld [vmem:[%s2229_s2 + $0x90] ss:$12 sps:$4 sm:$0xff]   ;;  %v1989_v48 = vld [vmem:[%s2229_s2 + $0x68] ss:$12 sps:$4 sm:$0xff]   ;;  %v1998_v50 = vld [vmem:[#allocation2] sm:$0xff]  ;;  %v598_v57 = vsub.s32 0, %v597_v56 }
  0x24   : > { %1479 = vmatpush3.bf16.msra.mxu1 %v1639_v17  ;;  %v1996_v49 = vld [vmem:[%s2229_s2 + $0xa8] ss:$12 sps:$4 sm:$0xff]   ;;  %v2005_v51 = vld [vmem:[%s2229_s2 + $0x80] ss:$12 sps:$4 sm:$0xff]   ;;  %v635_v52 = vpack.c.bf16 %v1998_v50, %v1998_v50  ;;  %v2016_v53 = vld [vmem:[%s2229_s2 + $0x98] ss:$12 sps:$4 sm:$0xff]  }
  0x25   : > { %1480 = vmatprep.subr.bf16.mxu1 %v1643_v20  ;;  %v2026_v54 = vld [vmem:[%s2229_s2 + $0xb0] ss:$12 sps:$4 sm:$0xff]   ;;  %v594_v58 = vld [vmem:[%s2230_s3] sm:$0x7]  ;;  %v602_v59 = vsub.s32 1, %v597_v56  ;;  %v606_v4 = vsub.s32 2, %v597_v56 }
  0x26   : > { %457 = vmatpush1.bf16.msra.mxu0 %v1620_v14  ;;  %v599_v60 = vrot.slane %v594_v58, %v598_v57  ;;  %p1405_p5 = scmp.ne.s32.totalorder %s1780_s25, 1 }
  0x27   : > { %458 = vmatprep.subr.bf16.mxu0 %v1621_v16  ;;  %v603_v63 = vrot.slane %v594_v58, %v602_v59  ;;  %v607_v6 = vrot.slane %v594_v58, %v606_v4  ;;  %vm1733_vm1 = vmmov (!%p1405_p5), 0  }
  0x28   : > { %1481 = vmatpush3.bf16.msra.mxu1 %v1643_v20 }
  0x29   : > { %1482 = vmatprep.subr.bf16.mxu1 %v1647_v23 }
  0x2a   : > { %459 = vmatpush1.bf16.msra.mxu0 %v1623_v18 }
  0x2b   : > { %460 = vmatprep.subr.bf16.mxu0 %v1624_v19 }
  0x2c   : > { %1483 = vmatpush3.bf16.msra.mxu1 %v1647_v23 }
  0x2d   : > { %1484 = vmatprep.subr.bf16.mxu1 %v1651_v26 }
  0x2e   : > { %461 = vmatpush1.bf16.msra.mxu0 %v1626_v21 }
  0x2f   : > { %462 = vmatprep.subr.bf16.mxu0 %v1628_v22  ;;  %v611_v22 = vld [vmem:[%s2231_s4] sm:$0x7] }
  0x30   : > { %1485 = vmatpush3.bf16.msra.mxu1 %v1651_v26  ;;  %v2087_v23 = vrot.slane %v611_v22, %v598_v57 }
  0x31   : > { %1486 = vmatprep.subr.bf16.mxu1 %v1656_v29 }
  0x32   : > { %463 = vmatpush1.bf16.msra.mxu0 %v1630_v24  ;;  %v2089_v24 = vrot.slane %v611_v22, %v602_v59 }
  0x33   : > { %764 = vmatprep.subr.bf16.mxu0 %v1862_v25 }
  0x34   : > { %1487 = vmatpush3.bf16.msra.mxu1 %v1656_v29 }
  0x35   : > { %481 = vmatmul.mubr.bf16.vlgmr.msra.gmra.mrb[0].mxu0 %v1632_v13  ;;  %1492 = vmatprep.subr.bf16.mxu1 %v1730_v36 }
  0x36   : > { %765 = vmatpush1.bf16.msra.mxu0 %v1870_v27  ;;  %490 = vmatprep.mubr.bf16.mxu0 %v1729_v3 }
  0x37   : > { %766 = vmatprep.subr.bf16.mxu0 %v1876_v28  ;;  %1489 = vmatmul.mubr.bf16.vlgmr.msra.gmra.mrb[0].mxu1 %v1655_v32 }
  0x38   : > { %1493 = vmatpush3.bf16.msra.mxu1 %v1910_v35  ;;  %1508 = vmatprep.mubr.msk.bf16.mxu1 %vm1731_vm0, %v1730_v36 }
  0x39   : > { %1494 = vmatprep.subr.bf16.mxu1 %v1730_v36 }
  0x3a   : > { %767 = vmatpush1.bf16.msra.mxu0 %v1885_v30 }
  0x3b   : > { %768 = vmatprep.subr.bf16.mxu0 %v1892_v31 }
  0x3c   : > { %1495 = vmatpush3.bf16.msra.mxu1 %v1930_v39 }
  0x3d   : > { %491 = vmatmul.mubr.bf16.gmra.mrb[4].mxu0 %v1655_v32  ;;  %1496 = vmatprep.subr.bf16.mxu1 %v1730_v36 }
  0x3e   : > { %769 = vmatpush1.bf16.msra.mxu0 %v1899_v33  ;;  %796 = vmatprep.mubr.bf16.mxu0 %v1729_v3 }
  0x3f   : > { %770 = vmatprep.subr.bf16.mxu0 %v1905_v34 }
  0x40   : > { %1497 = vmatpush3.bf16.msra.mxu1 %v1951_v42 }
  0x41   : > { %1498 = vmatprep.subr.bf16.mxu1 %v1730_v36 }
  0x42   : > { %771 = vmatpush1.bf16.msra.mxu0 %v1917_v37 }
  0x43   : > { %772 = vmatprep.subr.bf16.mxu0 %v1924_v38 }
  0x44   : > { %1499 = vmatpush3.bf16.msra.mxu1 %v1970_v45 }
  0x45   : > { %1500 = vmatprep.subr.bf16.mxu1 %v1730_v36 }
  0x46   : > { %773 = vmatpush1.bf16.msra.mxu0 %v1939_v40 }
  0x47   : > { %774 = vmatprep.subr.bf16.mxu0 %v1945_v41 }
  0x48   : > { %1501 = vmatpush3.bf16.msra.mxu1 %v1989_v48 }
  0x49   : > { %1502 = vmatprep.subr.bf16.mxu1 %v1730_v36 }
  0x4a   : > { %775 = vmatpush1.bf16.msra.mxu0 %v1958_v43 }
  0x4b   : > { %776 = vmatprep.subr.bf16.mxu0 %v1964_v44 }
  0x4c   : > { %1503 = vmatpush3.bf16.msra.mxu1 %v2005_v51 }
  0x4d   : > { %1504 = vmatprep.subr.bf16.mxu1 %v1730_v36 }
  0x4e   : > { %777 = vmatpush1.bf16.msra.mxu0 %v1977_v46 }
  0x4f   : > { %778 = vmatprep.subr.bf16.mxu0 %v1983_v47 }
  0x50   : > { %1505 = vmatpush3.bf16.msra.mxu1 %v2016_v53 }
  0x51   : > { %1506 = vmatprep.subr.bf16.mxu1 %v1730_v36 }
  0x52   : > { %779 = vmatpush1.bf16.msra.mxu0 %v1996_v49 }
  0x53   : > { %873 = vmatprep.subr.bf16.mxu0 %v1862_v25 }
  0x54   : > { %1507 = vmatpush3.bf16.msra.mxu1 %v2026_v54 }
  0x55   : > { %797 = vmatmul.mubr.bf16.vlgmr.msra.gmra.mrb[8].mxu0 %v635_v52  ;;  %1512 = vmatprep.subr.bf16.mxu1 %v1730_v36 }
  0x56   : > { %874 = vmatpush1.bf16.msra.mxu0 %v1870_v27  ;;  %905 = vmatprep.mubr.bf16.mxu0 %v1729_v3 }
  0x57   : > { %875 = vmatprep.subr.bf16.mxu0 %v1876_v28  ;;  %1509 = vmatmul.mubr.bf16.vlgmr.msra.gmra.mrb[4].mxu1 %v635_v52 }
  0x58   : > { %1513 = vmatpush3.bf16.msra.mxu1 %v1910_v35  ;;  %1528 = vmatprep.mubr.msk.bf16.mxu1 %vm1731_vm0, %v1730_v36 }
  0x59   : > { %1514 = vmatprep.subr.bf16.mxu1 %v1730_v36 }
  0x5a   : > { %876 = vmatpush1.bf16.msra.mxu0 %v1885_v30 }
  0x5b   : > { %877 = vmatprep.subr.bf16.mxu0 %v1892_v31 }
  0x5c   : > { %1515 = vmatpush3.bf16.msra.mxu1 %v1930_v39 }
  0x5d   : > { %1516 = vmatprep.subr.bf16.mxu1 %v1730_v36 }
  0x5e   : > { %878 = vmatpush1.bf16.msra.mxu0 %v1899_v33 }
  0x5f   : > { %879 = vmatprep.subr.bf16.mxu0 %v1905_v34 }
  0x60   : > { %1517 = vmatpush3.bf16.msra.mxu1 %v1951_v42 }
  0x61   : > { %1518 = vmatprep.subr.bf16.mxu1 %v1730_v36 }
  0x62   : > { %880 = vmatpush1.bf16.msra.mxu0 %v1917_v37 }
  0x63   : > { %881 = vmatprep.subr.bf16.mxu0 %v1924_v38 }
  0x64   : > { %1519 = vmatpush3.bf16.msra.mxu1 %v1970_v45 }
  0x65   : > { %1520 = vmatprep.subr.bf16.mxu1 %v1730_v36 }
  0x66   : > { %882 = vmatpush1.bf16.msra.mxu0 %v1939_v40 }
  0x67   : > { %883 = vmatprep.subr.bf16.mxu0 %v1945_v41 }
  0x68   : > { %1521 = vmatpush3.bf16.msra.mxu1 %v1989_v48 }
  0x69   : > { %1522 = vmatprep.subr.bf16.mxu1 %v1730_v36 }
  0x6a   : > { %884 = vmatpush1.bf16.msra.mxu0 %v1958_v43 }
  0x6b   : > { %885 = vmatprep.subr.bf16.mxu0 %v1964_v44 }
  0x6c   : > { %1523 = vmatpush3.bf16.msra.mxu1 %v2005_v51 }
  0x6d   : > { %1524 = vmatprep.subr.bf16.mxu1 %v1730_v36 }
  0x6e   : > { %886 = vmatpush1.bf16.msra.mxu0 %v1977_v46 }
  0x6f   : > { %887 = vmatprep.subr.bf16.mxu0 %v1983_v47 }
  0x70   : > { %1525 = vmatpush3.bf16.msra.mxu1 %v2016_v53 }
  0x71   : > { %1526 = vmatprep.subr.bf16.mxu1 %v1730_v36 }
  0x72   : > { %888 = vmatpush1.bf16.msra.mxu0 %v1996_v49 }
  0x73   : > { %982 = vmatprep.subr.bf16.mxu0 %v1862_v25 }
  0x74   : > { %1527 = vmatpush3.bf16.msra.mxu1 %v2026_v54 }
  0x75   : > { %1532 = vmatprep.subr.bf16.mxu1 %v1730_v36 }
 0x108   : > { %v482_v61 = vpop.f32.mrb[0].mxu0 }
 0x109   : > { %v484_v62 = vpop.f32.mrb[1].mxu0  ;;  %v632_v29 = vadd.f32 %v599_v60, %v482_v61  ;;  %v2093_v61 = vrot.slane %v611_v22, %v606_v4 }
 0x10a   : > { %v486_v0 = vpop.f32.mrb[2].mxu0  ;;  %v1490_v12 = vpop.f32.mrb[0].mxu1  ;;  %v633_v55 = vadd.f32 %v603_v63, %v484_v62 }
 0x10b   : > { %v2066_v1 = vadd.f32 %v599_v60, %v486_v0  ;;  %v488_v2 = vpop.f32.mrb[3].mxu0  ;;  %v2076_v15 = vadd.f32 %v1490_v12, %v607_v6  ;;  %v535_v16 = vpop.f32.mrb[1].mxu1 }
 0x10c   : > { %v2068_v5 = vadd.f32 %v603_v63, %v488_v2  ;;  %v1491_v18 = vpop.f32.mrb[2].mxu1 }
 0x10d   : > { %v2080_v19 = vadd.f32 %v1491_v18, %v607_v6  ;;  %v538_v20 = vpop.f32.mrb[3].mxu1 }
 0x10e   : > { %v2082_v21 = vadd.f32 %v607_v6, %v538_v20 }
 0x110   : > { %v492_v7 = vpop.f32.mrb[4].mxu0 }
 0x111   : > { %v2070_v8 = vadd.f32 %v599_v60, %v492_v7  ;;  %v494_v9 = vpop.f32.mrb[5].mxu0 }
 0x112   : > { %v2072_v10 = vadd.f32 %v603_v63, %v494_v9  ;;  %v496_v11 = vpop.f32.mrb[6].mxu0 }
 0x113   : > { %v2074_v13 = vadd.f32 %v599_v60, %v496_v11  ;;  %v498_v14 = vpop.f32.mrb[7].mxu0 }
 0x114   : > { %v2078_v17 = vadd.f32 %v603_v63, %v498_v14 }
 0x128   : > { %v798_v26 = vpop.f32.mrb[8].mxu0 }
 0x129   : > { %v799_v32 = vadd.f32 %v798_v26, %v2087_v23  ;;  %v800_v52 = vpop.f32.mrb[9].mxu0 }
 0x12a   : > { %v801_v56 = vadd.f32 %v800_v52, %v2089_v24  ;;  %v802_v58 = vpop.f32.mrb[10].mxu0  ;;  %v839_v12 = vpop.f32.mrb[4].mxu1 }
 0x12b   : > { %v845_v0 = vadd.f32 %v799_v32, %v632_v29  ;;  %v803_v2 = vpop.f32.mrb[11].mxu0  ;;  %v1510_v57 = vpop.f32.mrb[5].mxu1  ;;  %v840_v20 = vadd.f32 %v839_v12, %v2093_v61  ;;  %v634_v29 = vadd.f32 %v607_v6, %v535_v16 }
 0x12c   : > { %v852_v7 = vadd.f32 %v801_v56, %v633_v55  ;;  %v842_v14 = vpop.f32.mrb[6].mxu1 }
 0x12d   : > { %v1397_v9 = vmul.f32 -1.442695, %v845_v0  ;;  %v1511_v59 = vpop.f32.mrb[7].mxu1 }
 0x12e   : > { %v1398_v11 = vmul.f32 -1.442695, %v852_v7 }
 0x12f   : > { %1672 = vpow2.f32 %v1397_v9 }
 0x130   : > { %1674 = vpow2.f32 %v1398_v11 }
 0x139   : > { %v1673_v18 = vpop.eup %1672 }
 0x13a   : > { %v849_v60 = vadd.f32 1.0, %v1673_v18  ;;  %v1675_v62 = vpop.eup %1674 }
 0x13b   : > { %v856_v63 = vadd.f32 1.0, %v1675_v62 }
 0x13c   : > { %1676 = vrcp.f32 %v849_v60 }
 0x13d   : > { %1678 = vrcp.f32 %v856_v63 }
 0x146   : > { %v1677_v26 = vpop.eup %1676 }
 0x147   : > { %v859_v32 = vmul.f32 %v1677_v26, %v840_v20  ;;  %v1679_v55 = vpop.eup %1678 }
 0x148   : > { %v862_v56 = vsub.f32 1.0, %v1679_v55  ;;  %v864_v2 = vmul.f32 %v1679_v55, %v1998_v50 }
 0x149   : > { %v860_v52 = vadd.f32 %v859_v32, %v634_v29 }
 0x14b   : > { %1680 = vtanh.f32 %v860_v52 }
 0x155   : > { %v1681_v58 = vpop.eup %1680 }
 0x156   : > { %v863_v0 = vmul.f32 %v1681_v58, %v862_v56 }
 0x158   : > { %v2097_v7 = vadd.f32 %v864_v2, %v863_v0 }
 0x15a   : > { %v872_v4 = vpack.c.bf16 %v2097_v7, %v2097_v7 }
 0x15c   : > { %906 = vmatmul.mubr.bf16.vlgmr.msra.gmra.mrb[12].mxu0 %v872_v4  ;;  %1529 = vmatmul.mubr.bf16.vlgmr.msra.gmra.mrb[8].mxu1 %v872_v4 }
 0x15d   : > { %983 = vmatpush1.bf16.msra.mxu0 %v1870_v27  ;;  %1533 = vmatpush3.bf16.msra.mxu1 %v1910_v35 }
 0x15e   : > { %984 = vmatprep.subr.bf16.mxu0 %v1876_v28  ;;  %1534 = vmatprep.subr.bf16.mxu1 %v1730_v36 }
 0x15f   : > { %1014 = vmatprep.mubr.bf16.mxu0 %v1729_v3  ;;  %1548 = vmatprep.mubr.msk.bf16.mxu1 %vm1731_vm0, %v1730_v36 }
 0x161   : > { %985 = vmatpush1.bf16.msra.mxu0 %v1885_v30  ;;  %1535 = vmatpush3.bf16.msra.mxu1 %v1930_v39 }
 0x162   : > { %986 = vmatprep.subr.bf16.mxu0 %v1892_v31  ;;  %1536 = vmatprep.subr.bf16.mxu1 %v1730_v36 }
 0x165   : > { %987 = vmatpush1.bf16.msra.mxu0 %v1899_v33  ;;  %1537 = vmatpush3.bf16.msra.mxu1 %v1951_v42 }
 0x166   : > { %988 = vmatprep.subr.bf16.mxu0 %v1905_v34  ;;  %1538 = vmatprep.subr.bf16.mxu1 %v1730_v36 }
 0x169   : > { %989 = vmatpush1.bf16.msra.mxu0 %v1917_v37  ;;  %1539 = vmatpush3.bf16.msra.mxu1 %v1970_v45 }
 0x16a   : > { %990 = vmatprep.subr.bf16.mxu0 %v1924_v38  ;;  %1540 = vmatprep.subr.bf16.mxu1 %v1730_v36 }
 0x16d   : > { %991 = vmatpush1.bf16.msra.mxu0 %v1939_v40  ;;  %1541 = vmatpush3.bf16.msra.mxu1 %v1989_v48 }
 0x16e   : > { %992 = vmatprep.subr.bf16.mxu0 %v1945_v41  ;;  %1542 = vmatprep.subr.bf16.mxu1 %v1730_v36 }
 0x171   : > { %993 = vmatpush1.bf16.msra.mxu0 %v1958_v43  ;;  %1543 = vmatpush3.bf16.msra.mxu1 %v2005_v51 }
 0x172   : > { %994 = vmatprep.subr.bf16.mxu0 %v1964_v44  ;;  %1544 = vmatprep.subr.bf16.mxu1 %v1730_v36 }
 0x175   : > { %995 = vmatpush1.bf16.msra.mxu0 %v1977_v46  ;;  %1545 = vmatpush3.bf16.msra.mxu1 %v2016_v53 }
 0x176   : > { %996 = vmatprep.subr.bf16.mxu0 %v1983_v47  ;;  %1546 = vmatprep.subr.bf16.mxu1 %v1730_v36 }
 0x179   : > { %997 = vmatpush1.bf16.msra.mxu0 %v1996_v49  ;;  %1547 = vmatpush3.bf16.msra.mxu1 %v2026_v54 }
 0x17a   : > { %1091 = vmatprep.subr.bf16.mxu0 %v1862_v25  ;;  %1552 = vmatprep.subr.bf16.mxu1 %v1730_v36 }
 0x22f   : > { %v907_v50 = vpop.f32.mrb[12].mxu0  ;;  %v948_v6 = vpop.f32.mrb[8].mxu1 }
 0x230   : > { %v908_v16 = vadd.f32 %v907_v50, %v2087_v23  ;;  %v909_v22 = vpop.f32.mrb[13].mxu0  ;;  %v1530_v9 = vpop.f32.mrb[9].mxu1  ;;  %v949_v32 = vadd.f32 %v948_v6, %v2093_v61 }
 0x231   : > { %v910_v11 = vadd.f32 %v909_v22, %v2089_v24  ;;  %v911_v12 = vpop.f32.mrb[14].mxu0  ;;  %v951_v57 = vpop.f32.mrb[10].mxu1 }
 0x232   : > { %v954_v14 = vadd.f32 %v908_v16, %v2066_v1  ;;  %v912_v59 = vpop.f32.mrb[15].mxu0  ;;  %v1531_v18 = vpop.f32.mrb[11].mxu1 }
 0x233   : > { %v961_v60 = vadd.f32 %v910_v11, %v2068_v5 }
 0x234   : > { %v1399_v62 = vmul.f32 -1.442695, %v954_v14 }
 0x235   : > { %v1400_v25 = vmul.f32 -1.442695, %v961_v60 }
 0x236   : > { %1682 = vpow2.f32 %v1399_v62 }
 0x237   : > { %1684 = vpow2.f32 %v1400_v25 }
 0x240   : > { %v1683_v63 = vpop.eup %1682 }
 0x241   : > { %v958_v20 = vadd.f32 1.0, %v1683_v63  ;;  %v1685_v26 = vpop.eup %1684 }
 0x242   : > { %v965_v29 = vadd.f32 1.0, %v1685_v26 }
 0x243   : > { %1686 = vrcp.f32 %v958_v20 }
 0x244   : > { %1688 = vrcp.f32 %v965_v29 }
 0x24d   : > { %v1687_v52 = vpop.eup %1686 }
 0x24e   : > { %v968_v55 = vmul.f32 %v1687_v52, %v949_v32  ;;  %v1689_v56 = vpop.eup %1688 }
 0x24f   : > { %v971_v58 = vsub.f32 1.0, %v1689_v56  ;;  %v973_v2 = vmul.f32 %v1689_v56, %v2097_v7 }
 0x250   : > { %v969_v1 = vadd.f32 %v968_v55, %v2082_v21 }
 0x252   : > { %1690 = vtanh.f32 %v969_v1 }
 0x25c   : > { %v1691_v5 = vpop.eup %1690 }
 0x25d   : > { %v972_v0 = vmul.f32 %v1691_v5, %v971_v58  ;;  %v1732_v5 = vmov (!%p1405_p5), 0.0  }
 0x25f   : > { %v2143_v4 = vadd.f32 %v973_v2, %v972_v0  ;;  %v1714_v0 = vld [vmem:[%s2232_s5 + $0x10] sm:$0xff] (!%p1405_p5)   ;;  %v1715_v2 = vld [vmem:[%s2232_s5 + $0x18] sm:$0xff] (!%p1405_p5)  }
 0x261   : > { %v981_v50 = vpack.c.bf16 %v2143_v4, %v2143_v4 }
 0x263   : > { %1015 = vmatmul.mubr.bf16.vlgmr.msra.gmra.mrb[16].mxu0 %v981_v50  ;;  %1549 = vmatmul.mubr.bf16.vlgmr.msra.gmra.mrb[12].mxu1 %v981_v50  ;;  %v1717_v50 = vld [vmem:[%s2232_s5 + $0x28] sm:$0xff] (!%p1405_p5)  }
 0x264   : > { %1092 = vmatpush1.bf16.msra.mxu0 %v1870_v27  ;;  %1553 = vmatpush3.bf16.msra.mxu1 %v1910_v35 }
 0x265   : > { %1093 = vmatprep.subr.bf16.mxu0 %v1876_v28  ;;  %1554 = vmatprep.subr.bf16.mxu1 %v1730_v36 }
 0x266   : > { %1123 = vmatprep.mubr.bf16.mxu0 %v1729_v3  ;;  %1568 = vmatprep.mubr.msk.bf16.mxu1 %vm1731_vm0, %v1730_v36 }
 0x268   : > { %1094 = vmatpush1.bf16.msra.mxu0 %v1885_v30  ;;  %1555 = vmatpush3.bf16.msra.mxu1 %v1930_v39 }
 0x269   : > { %1095 = vmatprep.subr.bf16.mxu0 %v1892_v31  ;;  %1556 = vmatprep.subr.bf16.mxu1 %v1730_v36 }
 0x26c   : > { %1096 = vmatpush1.bf16.msra.mxu0 %v1899_v33  ;;  %1557 = vmatpush3.bf16.msra.mxu1 %v1951_v42 }
 0x26d   : > { %1097 = vmatprep.subr.bf16.mxu0 %v1905_v34  ;;  %1558 = vmatprep.subr.bf16.mxu1 %v1730_v36 }
 0x270   : > { %1098 = vmatpush1.bf16.msra.mxu0 %v1917_v37  ;;  %1559 = vmatpush3.bf16.msra.mxu1 %v1970_v45 }
 0x271   : > { %1099 = vmatprep.subr.bf16.mxu0 %v1924_v38  ;;  %1560 = vmatprep.subr.bf16.mxu1 %v1730_v36 }
 0x274   : > { %1100 = vmatpush1.bf16.msra.mxu0 %v1939_v40  ;;  %1561 = vmatpush3.bf16.msra.mxu1 %v1989_v48 }
 0x275   : > { %1101 = vmatprep.subr.bf16.mxu0 %v1945_v41  ;;  %1562 = vmatprep.subr.bf16.mxu1 %v1730_v36 }
 0x278   : > { %1102 = vmatpush1.bf16.msra.mxu0 %v1958_v43  ;;  %1563 = vmatpush3.bf16.msra.mxu1 %v2005_v51 }
 0x279   : > { %1103 = vmatprep.subr.bf16.mxu0 %v1964_v44  ;;  %1564 = vmatprep.subr.bf16.mxu1 %v1730_v36 }
 0x27c   : > { %1104 = vmatpush1.bf16.msra.mxu0 %v1977_v46  ;;  %1565 = vmatpush3.bf16.msra.mxu1 %v2016_v53 }
 0x27d   : > { %1105 = vmatprep.subr.bf16.mxu0 %v1983_v47  ;;  %1566 = vmatprep.subr.bf16.mxu1 %v1730_v36 }
 0x280   : > { %1106 = vmatpush1.bf16.msra.mxu0 %v1996_v49  ;;  %1567 = vmatpush3.bf16.msra.mxu1 %v2026_v54 }
 0x281   : > { %1572 = vmatprep.subr.bf16.mxu0 (!%p1405_p5), %v1732_v5 }
 0x336   : > { %v1016_v3 = vpop.f32.mrb[16].mxu0  ;;  %v1057_v27 = vpop.f32.mrb[12].mxu1 }
 0x337   : > { %v1017_v28 = vadd.f32 %v1016_v3, %v2087_v23  ;;  %v1018_v30 = vpop.f32.mrb[17].mxu0  ;;  %v1550_v31 = vpop.f32.mrb[13].mxu1  ;;  %v1058_v46 = vadd.f32 %v1057_v27, %v2093_v61  ;;  %v1718_v3 = vld [vmem:[%s2232_s5 + $0x30] sm:$0xff] (!%p1405_p5)   ;;  %v1719_v27 = vld [vmem:[%s2232_s5 + $0x38] sm:$0xff] (!%p1405_p5)  }
 0x338   : > { %v1019_v33 = vadd.f32 %v1018_v30, %v2089_v24  ;;  %v1020_v34 = vpop.f32.mrb[18].mxu0  ;;  %v1060_v35 = vpop.f32.mrb[14].mxu1  ;;  %v1406_v31 = vld [vmem:[%s2233_s6] ss:$0 sm:$0xff] (!%p1405_p5) }
 0x339   : > { %v1063_v37 = vadd.f32 %v1017_v28, %v2070_v8  ;;  %v1021_v38 = vpop.f32.mrb[19].mxu0  ;;  %v1551_v39 = vpop.f32.mrb[15].mxu1 }
 0x33a   : > { %v1070_v36 = vadd.f32 %v1019_v33, %v2072_v10 }
 0x33b   : > { %v1401_v40 = vmul.f32 -1.442695, %v1063_v37 }
 0x33c   : > { %v1402_v41 = vmul.f32 -1.442695, %v1070_v36 }
 0x33d   : > { %1692 = vpow2.f32 %v1401_v40 }
 0x33e   : > { %1694 = vpow2.f32 %v1402_v41 }
 0x347   : > { %v1693_v42 = vpop.eup %1692 }
 0x348   : > { %v1067_v43 = vadd.f32 1.0, %v1693_v42  ;;  %v1695_v44 = vpop.eup %1694 }
 0x349   : > { %v1074_v45 = vadd.f32 1.0, %v1695_v44 }
 0x34a   : > { %1696 = vrcp.f32 %v1067_v43 }
 0x34b   : > { %1698 = vrcp.f32 %v1074_v45 }
 0x354   : > { %v1697_v47 = vpop.eup %1696 }
 0x355   : > { %v1077_v48 = vmul.f32 %v1697_v47, %v1058_v46  ;;  %v1699_v51 = vpop.eup %1698 }
 0x356   : > { %v1080_v53 = vsub.f32 1.0, %v1699_v51  ;;  %v1082_v10 = vmul.f32 %v1699_v51, %v2143_v4  ;;  %v1716_v4 = vld [vmem:[%s2232_s5 + $0x20] sm:$0xff] (!%p1405_p5)  }
 0x357   : > { %v1078_v49 = vadd.f32 %v1077_v48, %v2076_v15 }
 0x359   : > { %1700 = vtanh.f32 %v1078_v49 }
 0x363   : > { %v1701_v54 = vpop.eup %1700 }
 0x364   : > { %v1081_v8 = vmul.f32 %v1701_v54, %v1080_v53 }
 0x366   : > { %v1083_v21 = vadd.f32 %v1082_v10, %v1081_v8 }
 0x368   : > { %v1090_v7 = vpack.c.bf16 %v1083_v21, %v1083_v21 }
 0x36a   : > { %1124 = vmatmul.mubr.bf16.vlgmr.msra.gmra.mrb[20].mxu0 %v1090_v7  ;;  %1569 = vmatmul.mubr.bf16.vlgmr.msra.gmra.mrb[16].mxu1 %v1090_v7 }
 0x36b   : > { %1588 = vmatprep.mubr.msk.bf16.mxu0 (!%p1405_p5), %vm1733_vm1, %v1732_v5 }
 0x43d   : > { %v1125_v6 = vpop.f32.mrb[20].mxu0  ;;  %v1166_v16 = vpop.f32.mrb[16].mxu1 }
 0x43e   : > { %v1126_v22 = vadd.f32 %v1125_v6, %v2087_v23  ;;  %v1127_v9 = vpop.f32.mrb[21].mxu0  ;;  %v1570_v11 = vpop.f32.mrb[17].mxu1  ;;  %v1167_v29 = vadd.f32 %v1166_v16, %v2093_v61  ;;  %v1712_v61 = vld [vmem:[%s2232_s5] sm:$0xff] (!%p1405_p5)  }
 0x43f   : > { %v1128_v12 = vadd.f32 %v1127_v9, %v2089_v24  ;;  %v1129_v15 = vpop.f32.mrb[22].mxu0  ;;  %v1169_v57 = vpop.f32.mrb[18].mxu1  ;;  %1573 = vmatpush3.bf16.msra.mxu0 (!%p1405_p5), %v1712_v61 }
 0x440   : > { %v1172_v14 = vadd.f32 %v1126_v22, %v2074_v13  ;;  %v1130_v59 = vpop.f32.mrb[23].mxu0  ;;  %v1571_v18 = vpop.f32.mrb[19].mxu1  ;;  %1574 = vmatprep.subr.bf16.mxu0 (!%p1405_p5), %v1732_v5 }
 0x441   : > { %v1179_v60 = vadd.f32 %v1128_v12, %v2078_v17 }
 0x442   : > { %v1403_v62 = vmul.f32 -1.442695, %v1172_v14 }
 0x443   : > { %v1404_v25 = vmul.f32 -1.442695, %v1179_v60 }
 0x444   : > { %1702 = vpow2.f32 %v1403_v62 }
 0x445   : > { %1704 = vpow2.f32 %v1404_v25 }
 0x44e   : > { %v1703_v63 = vpop.eup %1702 }
 0x44f   : > { %v1176_v20 = vadd.f32 1.0, %v1703_v63  ;;  %v1705_v23 = vpop.eup %1704 }
 0x450   : > { %v1183_v26 = vadd.f32 1.0, %v1705_v23 }
 0x451   : > { %1706 = vrcp.f32 %v1176_v20 }
 0x452   : > { %1708 = vrcp.f32 %v1183_v26 }
 0x45b   : > { %v1707_v24 = vpop.eup %1706 }
 0x45c   : > { %v1186_v32 = vmul.f32 %v1707_v24, %v1167_v29  ;;  %v1709_v52 = vpop.eup %1708 }
 0x45d   : > { %v1189_v55 = vsub.f32 1.0, %v1709_v52  ;;  %v1191_v56 = vmul.f32 %v1709_v52, %v1083_v21 }
 0x45e   : > { %v1187_v13 = vadd.f32 %v1186_v32, %v2080_v19  ;;  %v1713_v19 = vld [vmem:[%s2232_s5 + $0x8] sm:$0xff] (!%p1405_p5)  }
 0x45f   : > { %1575 = vmatpush3.bf16.msra.mxu0 (!%p1405_p5), %v1713_v19 }
 0x460   : > { %1710 = vtanh.f32 %v1187_v13  ;;  %1576 = vmatprep.subr.bf16.mxu0 (!%p1405_p5), %v1732_v5 }
 0x463   : > { %1577 = vmatpush3.bf16.msra.mxu0 (!%p1405_p5), %v1714_v0 }
 0x464   : > { %1578 = vmatprep.subr.bf16.mxu0 (!%p1405_p5), %v1732_v5 }
 0x467   : > { %1579 = vmatpush3.bf16.msra.mxu0 (!%p1405_p5), %v1715_v2 }
 0x468   : > { %1580 = vmatprep.subr.bf16.mxu0 (!%p1405_p5), %v1732_v5 }
 0x469   : > { %1197 = sbr.rel (%p1405_p5) target bundleno = 1361 (0x551), region = 56 }
 0x46a   : > { %v1711_v17 = vpop.eup %1710 }
 0x46b   : > { %v1190_v1 = vmul.f32 %v1711_v17, %v1189_v55  ;;  %1581 = vmatpush3.bf16.msra.mxu0 (!%p1405_p5), %v1716_v4 }
 0x46c   : > { %1582 = vmatprep.subr.bf16.mxu0 (!%p1405_p5), %v1732_v5 }
 0x46d   : > { %v1192_v58 = vadd.f32 %v1191_v56, %v1190_v1 }
 0x46f   : > { %1193 = vst [vmem:[#allocation2] sm:$0xff] %v1192_v58  ;;  %1583 = vmatpush3.bf16.msra.mxu0 (!%p1405_p5), %v1717_v50 }
 0x470   : > { %1584 = vmatprep.subr.bf16.mxu0 %v1732_v5 }
 0x473   : > { %1585 = vmatpush3.bf16.msra.mxu0 %v1718_v3 }
 0x474   : > { %1586 = vmatprep.subr.bf16.mxu0 %v1732_v5 }
 0x476   : > { %v1198_v28 = vld [vmem:[#allocation2] sm:$0xff] }
 0x477   : > { %v1199_v30 = vpack.c.bf16 %v1198_v28, %v1198_v28  ;;  %1587 = vmatpush3.bf16.msra.mxu0 %v1719_v27 }
 0x47a   : > { %1589 = vmatmul.mubr.bf16.vlgmr.msra.gmra.mrb[0].mxu0 %v1199_v30 }
 0x54d   : > { %v1305_v33 = vpop.f32.mrb[0].mxu0 }
 0x54e   : > { %v1306_v34 = vadd.f32 %v1406_v31, %v1305_v33  ;;  %v1590_v35 = vpop.f32.mrb[1].mxu0 }
 0x54f   : > { %v1308_v37 = vpop.f32.mrb[2].mxu0 }
 0x550   : > { %1311 = vst [vmem:[%s2234_s7] sm:$0xff] %v1306_v34  ;;  %v1591_v38 = vpop.f32.mrb[3].mxu0 }
 0x551 PF: > { %s17_s24 = sadd.s32 1, %s1726_s24  }
 0x552   : > { %p14_p6 = scmp.ge.s32.totalorder %s17_s24, 4  }
 0x554   :  { %16 = sbr.rel (!%p14_p6) target bundleno = 1 (0x1), region = 82 }

</bundles_post_ra>
